<compile_context>
chip_gen: v7x
topology: tpu7x:2x2x1
jax: 0.10.0
libtpu: 0.0.40
codegen_flags: <defaults>
</compile_context>

<pallas_src>
import math

import jax
import jax.numpy as jnp
from jax.experimental import pallas as pl
from jax.experimental.pallas import tpu as pltpu

# ---------------- small ViT config (structure of torchvision ViT) ------------
IMAGE_SIZE = 16
PATCH_SIZE = 8
IN_CHANNELS = 3
HIDDEN_DIM = 32
NUM_HEADS = 2
HEAD_DIM = HIDDEN_DIM // NUM_HEADS
MLP_DIM = 64
NUM_LAYERS = 2
NUM_CLASSES = 10
BATCH = 2
NUM_PATCHES = (IMAGE_SIZE // PATCH_SIZE) ** 2
SEQ_LEN = NUM_PATCHES + 1  # +1 class token
CPP = IN_CHANNELS * PATCH_SIZE * PATCH_SIZE
LN_EPS = 1e-6
NEG_INF = -1e30
WVEC = 3 * HIDDEN_DIM  # packed-slab lane width (96): widest per-layer row (qkv bias)


# ---------------- in-kernel helpers ------------------------------------------
def _erf_approx(x):
    # Abramowitz & Stegun 7.1.26, |err| < 1.5e-7. Used for the exact (erf-based)
    # torch.nn.GELU since lax.erf may not lower in Mosaic. The reciprocal is on
    # the EUP (approx) — effect on GELU output is ~1e-5-level, below the poly err
    # already accepted; switch approx=False if bit-tighter parity is needed.
    a1, a2, a3, a4, a5 = 0.254829592, -0.284496736, 1.421413741, -1.453152027, 1.061405429
    p = 0.3275911
    ax = jnp.abs(x)
    t = pl.reciprocal(1.0 + p * ax, approx=True)
    poly = ((((a5 * t + a4) * t + a3) * t + a2) * t + a1) * t
    y = 1.0 - poly * jnp.exp(-ax * ax)
    return jnp.where(x >= 0.0, y, -y)


def _gelu_exact(x):
    return 0.5 * x * (1.0 + _erf_approx(x * (1.0 / math.sqrt(2.0))))


def _ln(x, g, b):
    mean = jnp.mean(x, axis=-1, keepdims=True)
    c = x - mean
    var = jnp.mean(c * c, axis=-1, keepdims=True)
    return c * jax.lax.rsqrt(var + LN_EPS) * g + b


# ---------------- fused ViT forward kernel ------------------------------------
def _vit_fused_kernel(
    patches_ref,   # (B*S, Cpp)        class-token rows are zero
    wd_ref,        # (3L+1, D, 96)     per layer [qkv_w | out_w(pad) | mlp_w1(pad)], then head_w(pad)
    tall_ref,      # (Cpp + L*M, D)    conv_w rows, then each layer's mlp_w2
    vecs_ref,      # (8L+3, 96)        per layer 8 bias/LN rows, then lnf_g/lnf_b/head_b
    bias_add_ref,  # (B*S, D)          conv bias + pos embedding (+ class token on cls rows)
    mask_ref,      # (B*S, B*S)        block-diagonal attention mask (0 / -1e30)
    sel_ref,       # (B, B*S)          one-hot class-token row selector
    logits_ref,    # (B, NC)           <- only HBM write
):
    f32 = jnp.float32
    D, Dh, H, M, L, NC = HIDDEN_DIM, HEAD_DIM, NUM_HEADS, MLP_DIM, NUM_LAYERS, NUM_CLASSES
    scale = 1.0 / math.sqrt(Dh)

    mask = mask_ref[...]
    vecs = vecs_ref[...]          # tiny; load once, static row slices below

    # Patch embedding + class token + positional embedding.
    # bias_add already folds conv bias / class token / pos embedding, and the
    # class-token rows of `patches` are zero, so one matmul + add suffices.
    conv_w = tall_ref[0:CPP, :]
    h = jnp.dot(patches_ref[...], conv_w, preferred_element_type=f32) + bias_add_ref[...]

    # torchvision EncoderBlock:
    #   x = ln_1(input); x = MHA(x); x = x + input
    #   y = ln_2(x);     y = MLP(y); return x + y
    for l in range(L):
        r = 8 * l
        ln1_g, ln1_b = vecs[r + 0:r + 1, :D], vecs[r + 1:r + 2, :D]
        qkv_b = vecs[r + 2:r + 3, :3 * D]
        out_b = vecs[r + 3:r + 4, :D]
        ln2_g, ln2_b = vecs[r + 4:r + 5, :D], vecs[r + 5:r + 6, :D]
        mlp_b1 = vecs[r + 6:r + 7, :M]
        mlp_b2 = vecs[r + 7:r + 8, :D]

        # ---- attention: fused QKV projection, per-head softmax via block-
        # ---- diagonal mask (all batches in one matmul), concat-heads out-proj.
        x = _ln(h, ln1_g, ln1_b)
        qkv = jnp.dot(x, wd_ref[3 * l][:, :3 * D], preferred_element_type=f32) + qkv_b
        ho = []
        for hd in range(H):
            q = qkv[:, hd * Dh:(hd + 1) * Dh] * scale
            k = qkv[:, D + hd * Dh:D + (hd + 1) * Dh]
            v = qkv[:, 2 * D + hd * Dh:2 * D + (hd + 1) * Dh]
            s = jax.lax.dot_general(q, k, (((1,), (1,)), ((), ())),
                                    preferred_element_type=f32) + mask
            s = s - jnp.max(s, axis=-1, keepdims=True)
            pattn = jnp.exp(s)
            # exact reciprocal: rows sum to 1 (tight parity with torch softmax)
            pattn = pattn * pl.reciprocal(jnp.sum(pattn, axis=-1, keepdims=True),
                                          approx=False)
            ho.append(jnp.dot(pattn, v, preferred_element_type=f32))   # (B*S, Dh)
        ho = jnp.concatenate(ho, axis=-1)                               # (B*S, H*Dh)
        h = h + out_b
        h = h + jnp.dot(ho, wd_ref[3 * l + 1][:, :D], preferred_element_type=f32)

        # ---- MLP block (exact erf GELU, like torch.nn.GELU default) ----
        y = _ln(h, ln2_g, ln2_b)
        y = jnp.dot(y, wd_ref[3 * l + 2][:, :M], preferred_element_type=f32) + mlp_b1
        y = _gelu_exact(y)
        h = h + mlp_b2
        h = h + jnp.dot(y, tall_ref[CPP + M * l:CPP + M * (l + 1), :],
                        preferred_element_type=f32)

    # Class-token extraction (one-hot selector matmul, no gathers) BEFORE the
    # final LN — LN is per-row so it commutes with row selection — then the
    # replaced classification head.
    fr = 8 * L
    cls = jnp.dot(sel_ref[...], h, preferred_element_type=f32)          # (B, D)
    cls = _ln(cls, vecs[fr:fr + 1, :D], vecs[fr + 1:fr + 2, :D])
    logits_ref[...] = (jnp.dot(cls, wd_ref[3 * L][:, :NC], preferred_element_type=f32)
                       + vecs[fr + 2:fr + 3, :NC])


def _full_spec(shape):
    nd = len(shape)
    return pl.BlockSpec(shape, lambda i, _nd=nd: (0,) * _nd)


# ---------------- one-time parameter repacking (outside the jitted forward) ----
def prepare_packed(params, batch):
    """Pack all weights/constants into a few slabs. Run ONCE, not per call."""
    D, Dh, H, M, L = HIDDEN_DIM, HEAD_DIM, NUM_HEADS, MLP_DIM, NUM_LAYERS
    S, NC = SEQ_LEN, NUM_CLASSES
    BS = batch * S

    def pad_cols(a, cols=WVEC):
        a = jnp.asarray(a, jnp.float32)
        return jnp.pad(a, ((0, 0), (0, cols - a.shape[1])))

    def row(v):
        return pad_cols(jnp.asarray(v, jnp.float32).reshape(1, -1))

    conv_w = params["conv_w"].reshape(D, CPP).T                      # (Cpp, D)
    conv_b = params["conv_b"].reshape(1, D)
    pos = params["pos_embedding"].reshape(S, D)
    cls_tok = params["class_token"].reshape(1, D)
    # Per-sequence additive term: cls row gets class_token + pos[0] (no conv
    # bias — its patch row is zero); token rows get conv_b + pos.
    per_seq = jnp.concatenate([cls_tok + pos[:1], conv_b + pos[1:]], axis=0)
    bias_add = jnp.tile(per_seq, (batch, 1)).astype(jnp.float32)     # (BS, D)

    # Block-diagonal mask so all batches share one attention matmul.
    bid = jnp.arange(BS) // S
    mask = jnp.where(bid[:, None] == bid[None, :], 0.0, NEG_INF).astype(jnp.float32)
    # One-hot selector picking the class-token row of each batch.
    sel = jnp.zeros((batch, BS), jnp.float32).at[
        jnp.arange(batch), jnp.arange(batch) * S].set(1.0)

    layers = params["layers"]
    # wd slab: per layer [qkv_w (D,3D) | out_w (D,D) pad | mlp_w1 (D,M) pad] + head_w pad.
    wd_rows = []
    for lp in layers:
        wd_rows.append(pad_cols(lp["attn_in_w"]))     # (D, 96)  q|k|v columns
        wd_rows.append(pad_cols(lp["attn_out_w"]))    # (D, 96)  concat-heads out-proj
        wd_rows.append(pad_cols(lp["mlp_w1"]))        # (D, 96)
    wd_rows.append(pad_cols(params["head_w"]))        # (D, 96)
    wd = jnp.stack(wd_rows)                           # (3L+1, D, 96)

    # tall slab: conv_w rows, then each layer's mlp_w2 (all width D).
    tall = jnp.concatenate(
        [conv_w] + [jnp.asarray(lp["mlp_w2"], jnp.float32) for lp in layers],
        axis=0).astype(jnp.float32)                   # (Cpp + L*M, D)

    # vec slab: 8 rows per layer + 3 final rows, width 96.
    vec_rows = []
    for lp in layers:
        vec_rows += [row(lp["ln1_g"]), row(lp["ln1_b"]),
                     row(lp["attn_in_b"]), row(lp["attn_out_b"]),
                     row(lp["ln2_g"]), row(lp["ln2_b"]),
                     row(lp["mlp_b1"]), row(lp["mlp_b2"])]
    vec_rows += [row(params["ln_g"]), row(params["ln_b"]), row(params["head_b"])]
    vecs = jnp.concatenate(vec_rows, axis=0)          # (8L+3, 96)

    return dict(wd=wd, tall=tall, vecs=vecs,
                bias_add=bias_add, mask=mask, sel=sel)


# ---------------- ViT forward (single pallas_call) -----------------------------
def vit_forward(x, packed):
    # x: (B, C, H, W) NCHW, like PyTorch.
    B, C, Himg, Wimg = x.shape
    p = PATCH_SIZE
    nh, nw = Himg // p, Wimg // p
    NP = nh * nw
    S = NP + 1
    BS = B * S
    Cpp = C * p * p

    # ---- patchify (pure reshape/transpose glue; Conv2d kernel=stride=p) ----
    patches = (x.reshape(B, C, nh, p, nw, p)
                .transpose(0, 2, 4, 1, 3, 5)
                .reshape(B, NP, Cpp))
    # Prepend a zero row per batch for the class-token slot.
    patches = jnp.concatenate(
        [jnp.zeros((B, 1, Cpp), x.dtype), patches], axis=1
    ).reshape(BS, Cpp).astype(jnp.float32)

    inputs = (patches, packed["wd"], packed["tall"], packed["vecs"],
              packed["bias_add"], packed["mask"], packed["sel"])

    logits = pl.pallas_call(
        _vit_fused_kernel,
        out_shape=jax.ShapeDtypeStruct((B, NUM_CLASSES), jnp.float32),
        grid=(1,),
        in_specs=[_full_spec(a.shape) for a in inputs],
        out_specs=_full_spec((B, NUM_CLASSES)),
        compiler_params=pltpu.CompilerParams(
            dimension_semantics=("arbitrary",)),  # single TC; add a "parallel"
            # leading batch axis instead of growing B*S if BATCH ever grows.
    )(*inputs)
    return logits                                                # (B, num_classes)


# ---------------- deterministic parameter init ---------------------------------
def init_params(key):
    keys = iter(jax.random.split(key, 4 + 8 * NUM_LAYERS))

    def nrm(shape, scale=0.02):
        return (scale * jax.random.normal(next(keys), shape)).astype(jnp.float32)

    ones = lambda n: jnp.ones((n,), jnp.float32)
    zeros = lambda n: jnp.zeros((n,), jnp.float32)

    params = dict(
        conv_w=nrm((HIDDEN_DIM, IN_CHANNELS, PATCH_SIZE, PATCH_SIZE)),
        conv_b=zeros(HIDDEN_DIM),
        class_token=nrm((1, 1, HIDDEN_DIM)),
        pos_embedding=nrm((1, SEQ_LEN, HIDDEN_DIM)),
        ln_g=ones(HIDDEN_DIM),
        ln_b=zeros(HIDDEN_DIM),
        head_w=nrm((HIDDEN_DIM, NUM_CLASSES)),   # stored (in, out) = torch Linear weight^T
        head_b=zeros(NUM_CLASSES),
        layers=[],
    )
    for _ in range(NUM_LAYERS):
        params["layers"].append(dict(
            ln1_g=ones(HIDDEN_DIM), ln1_b=zeros(HIDDEN_DIM),
            attn_in_w=nrm((HIDDEN_DIM, 3 * HIDDEN_DIM)),   # in_proj_weight^T (q|k|v)
            attn_in_b=zeros(3 * HIDDEN_DIM),
            attn_out_w=nrm((HIDDEN_DIM, HIDDEN_DIM)),      # out_proj.weight^T
            attn_out_b=zeros(HIDDEN_DIM),
            ln2_g=ones(HIDDEN_DIM), ln2_b=zeros(HIDDEN_DIM),
            mlp_w1=nrm((HIDDEN_DIM, MLP_DIM)), mlp_b1=zeros(MLP_DIM),
            mlp_w2=nrm((MLP_DIM, HIDDEN_DIM)), mlp_b2=zeros(HIDDEN_DIM),
        ))
    # TODO(synk): dropout layers are identity here (eval-mode semantics).
    return params


if __name__ == "__main__":
    root = jax.random.PRNGKey(0)
    pkey, xkey = jax.random.split(root)
    params = init_params(pkey)
    # One-time repack (weights + constant mask/selector) — NOT re-traced per call.
    packed = prepare_packed(params, BATCH)
    x = jax.random.normal(xkey, (BATCH, IN_CHANNELS, IMAGE_SIZE, IMAGE_SIZE), jnp.float32)

    fwd = jax.jit(vit_forward)
    logits = jax.block_until_ready(fwd(x, packed))
    assert logits.shape == (BATCH, NUM_CLASSES)
    assert bool(jnp.all(jnp.isfinite(logits)))
    print("KERNEL_OK")
</pallas_src>

<mosaic_0001>
module attributes {stable_mosaic.version = 11 : i64} {
  func.func @_vit_fused_kernel(%arg0: i32, %arg1: memref<10x192xf32, #tpu.memory_space<vmem>>, %arg2: memref<7x32x96xf32, #tpu.memory_space<vmem>>, %arg3: memref<320x32xf32, #tpu.memory_space<vmem>>, %arg4: memref<19x96xf32, #tpu.memory_space<vmem>>, %arg5: memref<10x32xf32, #tpu.memory_space<vmem>>, %arg6: memref<10x10xf32, #tpu.memory_space<vmem>>, %arg7: memref<2x10xf32, #tpu.memory_space<vmem>>, %arg8: memref<2x10xf32, #tpu.memory_space<vmem>>) attributes {dimension_semantics = [#tpu.dimension_semantics<arbitrary>], iteration_bounds = array<i64: 1>, scalar_prefetch = 0 : i64, scratch_operands = 0 : i64, tpu.core_type = #tpu.core_type<tc>, window_params = [{pipeline_mode = #tpu.pipeline_mode<synchronous>, transform_indices = @transform_0, window_bounds = array<i64: 10, 192>}, {pipeline_mode = #tpu.pipeline_mode<synchronous>, transform_indices = @transform_1, window_bounds = array<i64: 7, 32, 96>}, {pipeline_mode = #tpu.pipeline_mode<synchronous>, transform_indices = @transform_2, window_bounds = array<i64: 320, 32>}, {pipeline_mode = #tpu.pipeline_mode<synchronous>, transform_indices = @transform_3, window_bounds = array<i64: 19, 96>}, {pipeline_mode = #tpu.pipeline_mode<synchronous>, transform_indices = @transform_4, window_bounds = array<i64: 10, 32>}, {pipeline_mode = #tpu.pipeline_mode<synchronous>, transform_indices = @transform_5, window_bounds = array<i64: 10, 10>}, {pipeline_mode = #tpu.pipeline_mode<synchronous>, transform_indices = @transform_6, window_bounds = array<i64: 2, 10>}, {pipeline_mode = #tpu.pipeline_mode<synchronous>, transform_indices = @transform_7, window_bounds = array<i64: 2, 10>}]} {
    %c0 = arith.constant 0 : index
    %c0_0 = arith.constant 0 : index
    %0 = vector.load %arg6[%c0, %c0_0] : memref<10x10xf32, #tpu.memory_space<vmem>>, vector<10x10xf32>
    %c0_1 = arith.constant 0 : index
    %c0_2 = arith.constant 0 : index
    %1 = vector.load %arg4[%c0_1, %c0_2] : memref<19x96xf32, #tpu.memory_space<vmem>>, vector<19x96xf32>
    %c0_3 = arith.constant 0 : index
    %c0_4 = arith.constant 0 : index
    %2 = vector.load %arg3[%c0_3, %c0_4] : memref<320x32xf32, #tpu.memory_space<vmem>>, vector<192x32xf32>
    %c0_5 = arith.constant 0 : index
    %c0_6 = arith.constant 0 : index
    %3 = vector.load %arg1[%c0_5, %c0_6] : memref<10x192xf32, #tpu.memory_space<vmem>>, vector<10x192xf32>
    %cst = arith.constant dense<0.000000e+00> : vector<10x32xf32>
    %4 = tpu.matmul %3, %2, %cst {dimension_numbers = #tpu.dot_dimension_numbers<[1], [0], [0], [1], [0, 0, 1, 1], [], []>} : vector<10x192xf32>, vector<192x32xf32>, vector<10x32xf32> -> vector<10x32xf32>
    %c0_7 = arith.constant 0 : index
    %c0_8 = arith.constant 0 : index
    %5 = vector.load %arg5[%c0_7, %c0_8] : memref<10x32xf32, #tpu.memory_space<vmem>>, vector<10x32xf32>
    %6 = arith.addf %4, %5 : vector<10x32xf32>
    %7 = vector.extract_strided_slice %1 {offsets = [0, 0], sizes = [1, 32], strides = [1, 1]} : vector<19x96xf32> to vector<1x32xf32>
    %8 = vector.extract_strided_slice %1 {offsets = [1, 0], sizes = [1, 32], strides = [1, 1]} : vector<19x96xf32> to vector<1x32xf32>
    %9 = vector.extract_strided_slice %1 {offsets = [2, 0], sizes = [1, 96], strides = [1, 1]} : vector<19x96xf32> to vector<1x96xf32>
    %10 = vector.extract_strided_slice %1 {offsets = [3, 0], sizes = [1, 32], strides = [1, 1]} : vector<19x96xf32> to vector<1x32xf32>
    %11 = vector.extract_strided_slice %1 {offsets = [4, 0], sizes = [1, 32], strides = [1, 1]} : vector<19x96xf32> to vector<1x32xf32>
    %12 = vector.extract_strided_slice %1 {offsets = [5, 0], sizes = [1, 32], strides = [1, 1]} : vector<19x96xf32> to vector<1x32xf32>
    %13 = vector.extract_strided_slice %1 {offsets = [6, 0], sizes = [1, 64], strides = [1, 1]} : vector<19x96xf32> to vector<1x64xf32>
    %14 = vector.extract_strided_slice %1 {offsets = [7, 0], sizes = [1, 32], strides = [1, 1]} : vector<19x96xf32> to vector<1x32xf32>
    %cst_9 = arith.constant dense<0.000000e+00> : vector<10xf32>
    %15 = vector.multi_reduction <add>, %6, %cst_9 [1] : vector<10x32xf32> to vector<10xf32>
    %16 = vector.shape_cast %15 : vector<10xf32> to vector<10x1xf32>
    %cst_10 = arith.constant 3.200000e+01 : f32
    %17 = vector.broadcast %cst_10 : f32 to vector<10x1xf32>
    %18 = arith.divf %16, %17 : vector<10x1xf32>
    %19 = vector.broadcast %18 : vector<10x1xf32> to vector<10x32xf32>
    %20 = arith.subf %6, %19 : vector<10x32xf32>
    %21 = arith.mulf %20, %20 : vector<10x32xf32>
    %cst_11 = arith.constant dense<0.000000e+00> : vector<10xf32>
    %22 = vector.multi_reduction <add>, %21, %cst_11 [1] : vector<10x32xf32> to vector<10xf32>
    %23 = vector.shape_cast %22 : vector<10xf32> to vector<10x1xf32>
    %cst_12 = arith.constant 3.200000e+01 : f32
    %24 = vector.broadcast %cst_12 : f32 to vector<10x1xf32>
    %25 = arith.divf %23, %24 : vector<10x1xf32>
    %cst_13 = arith.constant 9.99999997E-7 : f32
    %26 = vector.broadcast %cst_13 : f32 to vector<10x1xf32>
    %27 = arith.addf %25, %26 : vector<10x1xf32>
    %28 = math.rsqrt %27 : vector<10x1xf32>
    %29 = vector.broadcast %28 : vector<10x1xf32> to vector<10x32xf32>
    %30 = arith.mulf %20, %29 : vector<10x32xf32>
    %31 = vector.broadcast %7 : vector<1x32xf32> to vector<10x32xf32>
    %32 = arith.mulf %30, %31 : vector<10x32xf32>
    %33 = vector.broadcast %8 : vector<1x32xf32> to vector<10x32xf32>
    %34 = arith.addf %32, %33 : vector<10x32xf32>
    %c0_14 = arith.constant 0 : index
    %c0_15 = arith.constant 0 : index
    %c0_16 = arith.constant 0 : index
    %35 = vector.load %arg2[%c0_14, %c0_15, %c0_16] : memref<7x32x96xf32, #tpu.memory_space<vmem>>, vector<1x32x96xf32>
    %36 = vector.shape_cast %35 : vector<1x32x96xf32> to vector<32x96xf32>
    %cst_17 = arith.constant dense<0.000000e+00> : vector<10x96xf32>
    %37 = tpu.matmul %34, %36, %cst_17 {dimension_numbers = #tpu.dot_dimension_numbers<[1], [0], [0], [1], [0, 0, 1, 1], [], []>} : vector<10x32xf32>, vector<32x96xf32>, vector<10x96xf32> -> vector<10x96xf32>
    %38 = vector.broadcast %9 : vector<1x96xf32> to vector<10x96xf32>
    %39 = arith.addf %37, %38 : vector<10x96xf32>
    %40 = vector.extract_strided_slice %39 {offsets = [0, 0], sizes = [10, 16], strides = [1, 1]} : vector<10x96xf32> to vector<10x16xf32>
    %cst_18 = arith.constant 2.500000e-01 : f32
    %41 = vector.broadcast %cst_18 : f32 to vector<10x16xf32>
    %42 = arith.mulf %40, %41 : vector<10x16xf32>
    %43 = vector.extract_strided_slice %39 {offsets = [0, 32], sizes = [10, 16], strides = [1, 1]} : vector<10x96xf32> to vector<10x16xf32>
    %44 = vector.extract_strided_slice %39 {offsets = [0, 64], sizes = [10, 16], strides = [1, 1]} : vector<10x96xf32> to vector<10x16xf32>
    %cst_19 = arith.constant dense<0.000000e+00> : vector<10x10xf32>
    %45 = tpu.matmul %42, %43, %cst_19 {dimension_numbers = #tpu.dot_dimension_numbers<[1], [1], [0], [0], [0, 0, 1, 0], [], []>} : vector<10x16xf32>, vector<10x16xf32>, vector<10x10xf32> -> vector<10x10xf32>
    %46 = arith.addf %45, %0 : vector<10x10xf32>
    %cst_20 = arith.constant dense<0xFF800000> : vector<10xf32>
    %47 = vector.multi_reduction <maximumf>, %46, %cst_20 [1] : vector<10x10xf32> to vector<10xf32>
    %48 = vector.shape_cast %47 : vector<10xf32> to vector<10x1xf32>
    %49 = vector.broadcast %48 : vector<10x1xf32> to vector<10x10xf32>
    %50 = arith.subf %46, %49 : vector<10x10xf32>
    %51 = math.exp %50 : vector<10x10xf32>
    %cst_21 = arith.constant dense<0.000000e+00> : vector<10xf32>
    %52 = vector.multi_reduction <add>, %51, %cst_21 [1] : vector<10x10xf32> to vector<10xf32>
    %53 = vector.shape_cast %52 : vector<10xf32> to vector<10x1xf32>
    %54 = tpu.reciprocal %53 : vector<10x1xf32> -> vector<10x1xf32>
    %55 = vector.broadcast %54 : vector<10x1xf32> to vector<10x10xf32>
    %56 = arith.mulf %51, %55 : vector<10x10xf32>
    %cst_22 = arith.constant dense<0.000000e+00> : vector<10x16xf32>
    %57 = tpu.matmul %56, %44, %cst_22 {dimension_numbers = #tpu.dot_dimension_numbers<[1], [0], [0], [1], [0, 0, 1, 1], [], []>} : vector<10x10xf32>, vector<10x16xf32>, vector<10x16xf32> -> vector<10x16xf32>
    %58 = vector.extract_strided_slice %39 {offsets = [0, 16], sizes = [10, 16], strides = [1, 1]} : vector<10x96xf32> to vector<10x16xf32>
    %cst_23 = arith.constant 2.500000e-01 : f32
    %59 = vector.broadcast %cst_23 : f32 to vector<10x16xf32>
    %60 = arith.mulf %58, %59 : vector<10x16xf32>
    %61 = vector.extract_strided_slice %39 {offsets = [0, 48], sizes = [10, 16], strides = [1, 1]} : vector<10x96xf32> to vector<10x16xf32>
    %62 = vector.extract_strided_slice %39 {offsets = [0, 80], sizes = [10, 16], strides = [1, 1]} : vector<10x96xf32> to vector<10x16xf32>
    %cst_24 = arith.constant dense<0.000000e+00> : vector<10x10xf32>
    %63 = tpu.matmul %60, %61, %cst_24 {dimension_numbers = #tpu.dot_dimension_numbers<[1], [1], [0], [0], [0, 0, 1, 0], [], []>} : vector<10x16xf32>, vector<10x16xf32>, vector<10x10xf32> -> vector<10x10xf32>
    %64 = arith.addf %63, %0 : vector<10x10xf32>
    %cst_25 = arith.constant dense<0xFF800000> : vector<10xf32>
    %65 = vector.multi_reduction <maximumf>, %64, %cst_25 [1] : vector<10x10xf32> to vector<10xf32>
    %66 = vector.shape_cast %65 : vector<10xf32> to vector<10x1xf32>
    %67 = vector.broadcast %66 : vector<10x1xf32> to vector<10x10xf32>
    %68 = arith.subf %64, %67 : vector<10x10xf32>
    %69 = math.exp %68 : vector<10x10xf32>
    %cst_26 = arith.constant dense<0.000000e+00> : vector<10xf32>
    %70 = vector.multi_reduction <add>, %69, %cst_26 [1] : vector<10x10xf32> to vector<10xf32>
    %71 = vector.shape_cast %70 : vector<10xf32> to vector<10x1xf32>
    %72 = tpu.reciprocal %71 : vector<10x1xf32> -> vector<10x1xf32>
    %73 = vector.broadcast %72 : vector<10x1xf32> to vector<10x10xf32>
    %74 = arith.mulf %69, %73 : vector<10x10xf32>
    %cst_27 = arith.constant dense<0.000000e+00> : vector<10x16xf32>
    %75 = tpu.matmul %74, %62, %cst_27 {dimension_numbers = #tpu.dot_dimension_numbers<[1], [0], [0], [1], [0, 0, 1, 1], [], []>} : vector<10x10xf32>, vector<10x16xf32>, vector<10x16xf32> -> vector<10x16xf32>
    %76 = tpu.concatenate %57, %75 in 1 : vector<10x16xf32>, vector<10x16xf32> -> vector<10x32xf32>
    %77 = vector.broadcast %10 : vector<1x32xf32> to vector<10x32xf32>
    %78 = arith.addf %6, %77 : vector<10x32xf32>
    %c1 = arith.constant 1 : index
    %c0_28 = arith.constant 0 : index
    %c0_29 = arith.constant 0 : index
    %79 = vector.load %arg2[%c1, %c0_28, %c0_29] : memref<7x32x96xf32, #tpu.memory_space<vmem>>, vector<1x32x96xf32>
    %80 = vector.shape_cast %79 : vector<1x32x96xf32> to vector<32x96xf32>
    %81 = vector.extract_strided_slice %80 {offsets = [0, 0], sizes = [32, 32], strides = [1, 1]} : vector<32x96xf32> to vector<32x32xf32>
    %cst_30 = arith.constant dense<0.000000e+00> : vector<10x32xf32>
    %82 = tpu.matmul %76, %81, %cst_30 {dimension_numbers = #tpu.dot_dimension_numbers<[1], [0], [0], [1], [0, 0, 1, 1], [], []>} : vector<10x32xf32>, vector<32x32xf32>, vector<10x32xf32> -> vector<10x32xf32>
    %83 = arith.addf %78, %82 : vector<10x32xf32>
    %cst_31 = arith.constant dense<0.000000e+00> : vector<10xf32>
    %84 = vector.multi_reduction <add>, %83, %cst_31 [1] : vector<10x32xf32> to vector<10xf32>
    %85 = vector.shape_cast %84 : vector<10xf32> to vector<10x1xf32>
    %cst_32 = arith.constant 3.200000e+01 : f32
    %86 = vector.broadcast %cst_32 : f32 to vector<10x1xf32>
    %87 = arith.divf %85, %86 : vector<10x1xf32>
    %88 = vector.broadcast %87 : vector<10x1xf32> to vector<10x32xf32>
    %89 = arith.subf %83, %88 : vector<10x32xf32>
    %90 = arith.mulf %89, %89 : vector<10x32xf32>
    %cst_33 = arith.constant dense<0.000000e+00> : vector<10xf32>
    %91 = vector.multi_reduction <add>, %90, %cst_33 [1] : vector<10x32xf32> to vector<10xf32>
    %92 = vector.shape_cast %91 : vector<10xf32> to vector<10x1xf32>
    %cst_34 = arith.constant 3.200000e+01 : f32
    %93 = vector.broadcast %cst_34 : f32 to vector<10x1xf32>
    %94 = arith.divf %92, %93 : vector<10x1xf32>
    %cst_35 = arith.constant 9.99999997E-7 : f32
    %95 = vector.broadcast %cst_35 : f32 to vector<10x1xf32>
    %96 = arith.addf %94, %95 : vector<10x1xf32>
    %97 = math.rsqrt %96 : vector<10x1xf32>
    %98 = vector.broadcast %97 : vector<10x1xf32> to vector<10x32xf32>
    %99 = arith.mulf %89, %98 : vector<10x32xf32>
    %100 = vector.broadcast %11 : vector<1x32xf32> to vector<10x32xf32>
    %101 = arith.mulf %99, %100 : vector<10x32xf32>
    %102 = vector.broadcast %12 : vector<1x32xf32> to vector<10x32xf32>
    %103 = arith.addf %101, %102 : vector<10x32xf32>
    %c2 = arith.constant 2 : index
    %c0_36 = arith.constant 0 : index
    %c0_37 = arith.constant 0 : index
    %104 = vector.load %arg2[%c2, %c0_36, %c0_37] : memref<7x32x96xf32, #tpu.memory_space<vmem>>, vector<1x32x96xf32>
    %105 = vector.shape_cast %104 : vector<1x32x96xf32> to vector<32x96xf32>
    %106 = vector.extract_strided_slice %105 {offsets = [0, 0], sizes = [32, 64], strides = [1, 1]} : vector<32x96xf32> to vector<32x64xf32>
    %cst_38 = arith.constant dense<0.000000e+00> : vector<10x64xf32>
    %107 = tpu.matmul %103, %106, %cst_38 {dimension_numbers = #tpu.dot_dimension_numbers<[1], [0], [0], [1], [0, 0, 1, 1], [], []>} : vector<10x32xf32>, vector<32x64xf32>, vector<10x64xf32> -> vector<10x64xf32>
    %108 = vector.broadcast %13 : vector<1x64xf32> to vector<10x64xf32>
    %109 = arith.addf %107, %108 : vector<10x64xf32>
    %cst_39 = arith.constant 5.000000e-01 : f32
    %110 = vector.broadcast %cst_39 : f32 to vector<10x64xf32>
    %111 = arith.mulf %110, %109 : vector<10x64xf32>
    %cst_40 = arith.constant 0.707106769 : f32
    %112 = vector.broadcast %cst_40 : f32 to vector<10x64xf32>
    %113 = arith.mulf %109, %112 : vector<10x64xf32>
    %114 = math.absf %113 : vector<10x64xf32>
    %cst_41 = arith.constant 0.327591091 : f32
    %115 = vector.broadcast %cst_41 : f32 to vector<10x64xf32>
    %116 = arith.mulf %115, %114 : vector<10x64xf32>
    %cst_42 = arith.constant 1.000000e+00 : f32
    %117 = vector.broadcast %cst_42 : f32 to vector<10x64xf32>
    %118 = arith.addf %117, %116 : vector<10x64xf32>
    %119 = tpu.reciprocal %118 {approx = true} : vector<10x64xf32> -> vector<10x64xf32>
    %cst_43 = arith.constant 1.06140542 : f32
    %120 = vector.broadcast %cst_43 : f32 to vector<10x64xf32>
    %121 = arith.mulf %120, %119 : vector<10x64xf32>
    %cst_44 = arith.constant -1.45315206 : f32
    %122 = vector.broadcast %cst_44 : f32 to vector<10x64xf32>
    %123 = arith.addf %121, %122 : vector<10x64xf32>
    %124 = arith.mulf %123, %119 : vector<10x64xf32>
    %cst_45 = arith.constant 1.42141378 : f32
    %125 = vector.broadcast %cst_45 : f32 to vector<10x64xf32>
    %126 = arith.addf %124, %125 : vector<10x64xf32>
    %127 = arith.mulf %126, %119 : vector<10x64xf32>
    %cst_46 = arith.constant -0.284496725 : f32
    %128 = vector.broadcast %cst_46 : f32 to vector<10x64xf32>
    %129 = arith.addf %127, %128 : vector<10x64xf32>
    %130 = arith.mulf %129, %119 : vector<10x64xf32>
    %cst_47 = arith.constant 0.254829586 : f32
    %131 = vector.broadcast %cst_47 : f32 to vector<10x64xf32>
    %132 = arith.addf %130, %131 : vector<10x64xf32>
    %133 = arith.mulf %132, %119 : vector<10x64xf32>
    %cst_48 = arith.constant 0.000000e+00 : f32
    %134 = vector.broadcast %cst_48 : f32 to vector<10x64xf32>
    %135 = arith.subf %134, %114 : vector<10x64xf32>
    %136 = arith.mulf %135, %114 : vector<10x64xf32>
    %137 = math.exp %136 : vector<10x64xf32>
    %138 = arith.mulf %133, %137 : vector<10x64xf32>
    %cst_49 = arith.constant 1.000000e+00 : f32
    %139 = vector.broadcast %cst_49 : f32 to vector<10x64xf32>
    %140 = arith.subf %139, %138 : vector<10x64xf32>
    %cst_50 = arith.constant 0.000000e+00 : f32
    %141 = vector.broadcast %cst_50 : f32 to vector<10x64xf32>
    %142 = arith.cmpf oge, %113, %141 : vector<10x64xf32>
    %cst_51 = arith.constant 0.000000e+00 : f32
    %143 = vector.broadcast %cst_51 : f32 to vector<10x64xf32>
    %144 = arith.subf %143, %140 : vector<10x64xf32>
    %145 = arith.select %142, %140, %144 : vector<10x64xi1>, vector<10x64xf32>
    %cst_52 = arith.constant 1.000000e+00 : f32
    %146 = vector.broadcast %cst_52 : f32 to vector<10x64xf32>
    %147 = arith.addf %146, %145 : vector<10x64xf32>
    %148 = arith.mulf %111, %147 : vector<10x64xf32>
    %149 = vector.broadcast %14 : vector<1x32xf32> to vector<10x32xf32>
    %150 = arith.addf %83, %149 : vector<10x32xf32>
    %c192 = arith.constant 192 : index
    %c0_53 = arith.constant 0 : index
    %151 = vector.load %arg3[%c192, %c0_53] : memref<320x32xf32, #tpu.memory_space<vmem>>, vector<64x32xf32>
    %cst_54 = arith.constant dense<0.000000e+00> : vector<10x32xf32>
    %152 = tpu.matmul %148, %151, %cst_54 {dimension_numbers = #tpu.dot_dimension_numbers<[1], [0], [0], [1], [0, 0, 1, 1], [], []>} : vector<10x64xf32>, vector<64x32xf32>, vector<10x32xf32> -> vector<10x32xf32>
    %153 = arith.addf %150, %152 : vector<10x32xf32>
    %154 = vector.extract_strided_slice %1 {offsets = [8, 0], sizes = [1, 32], strides = [1, 1]} : vector<19x96xf32> to vector<1x32xf32>
    %155 = vector.extract_strided_slice %1 {offsets = [9, 0], sizes = [1, 32], strides = [1, 1]} : vector<19x96xf32> to vector<1x32xf32>
    %156 = vector.extract_strided_slice %1 {offsets = [10, 0], sizes = [1, 96], strides = [1, 1]} : vector<19x96xf32> to vector<1x96xf32>
    %157 = vector.extract_strided_slice %1 {offsets = [11, 0], sizes = [1, 32], strides = [1, 1]} : vector<19x96xf32> to vector<1x32xf32>
    %158 = vector.extract_strided_slice %1 {offsets = [12, 0], sizes = [1, 32], strides = [1, 1]} : vector<19x96xf32> to vector<1x32xf32>
    %159 = vector.extract_strided_slice %1 {offsets = [13, 0], sizes = [1, 32], strides = [1, 1]} : vector<19x96xf32> to vector<1x32xf32>
    %160 = vector.extract_strided_slice %1 {offsets = [14, 0], sizes = [1, 64], strides = [1, 1]} : vector<19x96xf32> to vector<1x64xf32>
    %161 = vector.extract_strided_slice %1 {offsets = [15, 0], sizes = [1, 32], strides = [1, 1]} : vector<19x96xf32> to vector<1x32xf32>
    %cst_55 = arith.constant dense<0.000000e+00> : vector<10xf32>
    %162 = vector.multi_reduction <add>, %153, %cst_55 [1] : vector<10x32xf32> to vector<10xf32>
    %163 = vector.shape_cast %162 : vector<10xf32> to vector<10x1xf32>
    %cst_56 = arith.constant 3.200000e+01 : f32
    %164 = vector.broadcast %cst_56 : f32 to vector<10x1xf32>
    %165 = arith.divf %163, %164 : vector<10x1xf32>
    %166 = vector.broadcast %165 : vector<10x1xf32> to vector<10x32xf32>
    %167 = arith.subf %153, %166 : vector<10x32xf32>
    %168 = arith.mulf %167, %167 : vector<10x32xf32>
    %cst_57 = arith.constant dense<0.000000e+00> : vector<10xf32>
    %169 = vector.multi_reduction <add>, %168, %cst_57 [1] : vector<10x32xf32> to vector<10xf32>
    %170 = vector.shape_cast %169 : vector<10xf32> to vector<10x1xf32>
    %cst_58 = arith.constant 3.200000e+01 : f32
    %171 = vector.broadcast %cst_58 : f32 to vector<10x1xf32>
    %172 = arith.divf %170, %171 : vector<10x1xf32>
    %cst_59 = arith.constant 9.99999997E-7 : f32
    %173 = vector.broadcast %cst_59 : f32 to vector<10x1xf32>
    %174 = arith.addf %172, %173 : vector<10x1xf32>
    %175 = math.rsqrt %174 : vector<10x1xf32>
    %176 = vector.broadcast %175 : vector<10x1xf32> to vector<10x32xf32>
    %177 = arith.mulf %167, %176 : vector<10x32xf32>
    %178 = vector.broadcast %154 : vector<1x32xf32> to vector<10x32xf32>
    %179 = arith.mulf %177, %178 : vector<10x32xf32>
    %180 = vector.broadcast %155 : vector<1x32xf32> to vector<10x32xf32>
    %181 = arith.addf %179, %180 : vector<10x32xf32>
    %c3 = arith.constant 3 : index
    %c0_60 = arith.constant 0 : index
    %c0_61 = arith.constant 0 : index
    %182 = vector.load %arg2[%c3, %c0_60, %c0_61] : memref<7x32x96xf32, #tpu.memory_space<vmem>>, vector<1x32x96xf32>
    %183 = vector.shape_cast %182 : vector<1x32x96xf32> to vector<32x96xf32>
    %cst_62 = arith.constant dense<0.000000e+00> : vector<10x96xf32>
    %184 = tpu.matmul %181, %183, %cst_62 {dimension_numbers = #tpu.dot_dimension_numbers<[1], [0], [0], [1], [0, 0, 1, 1], [], []>} : vector<10x32xf32>, vector<32x96xf32>, vector<10x96xf32> -> vector<10x96xf32>
    %185 = vector.broadcast %156 : vector<1x96xf32> to vector<10x96xf32>
    %186 = arith.addf %184, %185 : vector<10x96xf32>
    %187 = vector.extract_strided_slice %186 {offsets = [0, 0], sizes = [10, 16], strides = [1, 1]} : vector<10x96xf32> to vector<10x16xf32>
    %cst_63 = arith.constant 2.500000e-01 : f32
    %188 = vector.broadcast %cst_63 : f32 to vector<10x16xf32>
    %189 = arith.mulf %187, %188 : vector<10x16xf32>
    %190 = vector.extract_strided_slice %186 {offsets = [0, 32], sizes = [10, 16], strides = [1, 1]} : vector<10x96xf32> to vector<10x16xf32>
    %191 = vector.extract_strided_slice %186 {offsets = [0, 64], sizes = [10, 16], strides = [1, 1]} : vector<10x96xf32> to vector<10x16xf32>
    %cst_64 = arith.constant dense<0.000000e+00> : vector<10x10xf32>
    %192 = tpu.matmul %189, %190, %cst_64 {dimension_numbers = #tpu.dot_dimension_numbers<[1], [1], [0], [0], [0, 0, 1, 0], [], []>} : vector<10x16xf32>, vector<10x16xf32>, vector<10x10xf32> -> vector<10x10xf32>
    %193 = arith.addf %192, %0 : vector<10x10xf32>
    %cst_65 = arith.constant dense<0xFF800000> : vector<10xf32>
    %194 = vector.multi_reduction <maximumf>, %193, %cst_65 [1] : vector<10x10xf32> to vector<10xf32>
    %195 = vector.shape_cast %194 : vector<10xf32> to vector<10x1xf32>
    %196 = vector.broadcast %195 : vector<10x1xf32> to vector<10x10xf32>
    %197 = arith.subf %193, %196 : vector<10x10xf32>
    %198 = math.exp %197 : vector<10x10xf32>
    %cst_66 = arith.constant dense<0.000000e+00> : vector<10xf32>
    %199 = vector.multi_reduction <add>, %198, %cst_66 [1] : vector<10x10xf32> to vector<10xf32>
    %200 = vector.shape_cast %199 : vector<10xf32> to vector<10x1xf32>
    %201 = tpu.reciprocal %200 : vector<10x1xf32> -> vector<10x1xf32>
    %202 = vector.broadcast %201 : vector<10x1xf32> to vector<10x10xf32>
    %203 = arith.mulf %198, %202 : vector<10x10xf32>
    %cst_67 = arith.constant dense<0.000000e+00> : vector<10x16xf32>
    %204 = tpu.matmul %203, %191, %cst_67 {dimension_numbers = #tpu.dot_dimension_numbers<[1], [0], [0], [1], [0, 0, 1, 1], [], []>} : vector<10x10xf32>, vector<10x16xf32>, vector<10x16xf32> -> vector<10x16xf32>
    %205 = vector.extract_strided_slice %186 {offsets = [0, 16], sizes = [10, 16], strides = [1, 1]} : vector<10x96xf32> to vector<10x16xf32>
    %cst_68 = arith.constant 2.500000e-01 : f32
    %206 = vector.broadcast %cst_68 : f32 to vector<10x16xf32>
    %207 = arith.mulf %205, %206 : vector<10x16xf32>
    %208 = vector.extract_strided_slice %186 {offsets = [0, 48], sizes = [10, 16], strides = [1, 1]} : vector<10x96xf32> to vector<10x16xf32>
    %209 = vector.extract_strided_slice %186 {offsets = [0, 80], sizes = [10, 16], strides = [1, 1]} : vector<10x96xf32> to vector<10x16xf32>
    %cst_69 = arith.constant dense<0.000000e+00> : vector<10x10xf32>
    %210 = tpu.matmul %207, %208, %cst_69 {dimension_numbers = #tpu.dot_dimension_numbers<[1], [1], [0], [0], [0, 0, 1, 0], [], []>} : vector<10x16xf32>, vector<10x16xf32>, vector<10x10xf32> -> vector<10x10xf32>
    %211 = arith.addf %210, %0 : vector<10x10xf32>
    %cst_70 = arith.constant dense<0xFF800000> : vector<10xf32>
    %212 = vector.multi_reduction <maximumf>, %211, %cst_70 [1] : vector<10x10xf32> to vector<10xf32>
    %213 = vector.shape_cast %212 : vector<10xf32> to vector<10x1xf32>
    %214 = vector.broadcast %213 : vector<10x1xf32> to vector<10x10xf32>
    %215 = arith.subf %211, %214 : vector<10x10xf32>
    %216 = math.exp %215 : vector<10x10xf32>
    %cst_71 = arith.constant dense<0.000000e+00> : vector<10xf32>
    %217 = vector.multi_reduction <add>, %216, %cst_71 [1] : vector<10x10xf32> to vector<10xf32>
    %218 = vector.shape_cast %217 : vector<10xf32> to vector<10x1xf32>
    %219 = tpu.reciprocal %218 : vector<10x1xf32> -> vector<10x1xf32>
    %220 = vector.broadcast %219 : vector<10x1xf32> to vector<10x10xf32>
    %221 = arith.mulf %216, %220 : vector<10x10xf32>
    %cst_72 = arith.constant dense<0.000000e+00> : vector<10x16xf32>
    %222 = tpu.matmul %221, %209, %cst_72 {dimension_numbers = #tpu.dot_dimension_numbers<[1], [0], [0], [1], [0, 0, 1, 1], [], []>} : vector<10x10xf32>, vector<10x16xf32>, vector<10x16xf32> -> vector<10x16xf32>
    %223 = tpu.concatenate %204, %222 in 1 : vector<10x16xf32>, vector<10x16xf32> -> vector<10x32xf32>
    %224 = vector.broadcast %157 : vector<1x32xf32> to vector<10x32xf32>
    %225 = arith.addf %153, %224 : vector<10x32xf32>
    %c4 = arith.constant 4 : index
    %c0_73 = arith.constant 0 : index
    %c0_74 = arith.constant 0 : index
    %226 = vector.load %arg2[%c4, %c0_73, %c0_74] : memref<7x32x96xf32, #tpu.memory_space<vmem>>, vector<1x32x96xf32>
    %227 = vector.shape_cast %226 : vector<1x32x96xf32> to vector<32x96xf32>
    %228 = vector.extract_strided_slice %227 {offsets = [0, 0], sizes = [32, 32], strides = [1, 1]} : vector<32x96xf32> to vector<32x32xf32>
    %cst_75 = arith.constant dense<0.000000e+00> : vector<10x32xf32>
    %229 = tpu.matmul %223, %228, %cst_75 {dimension_numbers = #tpu.dot_dimension_numbers<[1], [0], [0], [1], [0, 0, 1, 1], [], []>} : vector<10x32xf32>, vector<32x32xf32>, vector<10x32xf32> -> vector<10x32xf32>
    %230 = arith.addf %225, %229 : vector<10x32xf32>
    %cst_76 = arith.constant dense<0.000000e+00> : vector<10xf32>
    %231 = vector.multi_reduction <add>, %230, %cst_76 [1] : vector<10x32xf32> to vector<10xf32>
    %232 = vector.shape_cast %231 : vector<10xf32> to vector<10x1xf32>
    %cst_77 = arith.constant 3.200000e+01 : f32
    %233 = vector.broadcast %cst_77 : f32 to vector<10x1xf32>
    %234 = arith.divf %232, %233 : vector<10x1xf32>
    %235 = vector.broadcast %234 : vector<10x1xf32> to vector<10x32xf32>
    %236 = arith.subf %230, %235 : vector<10x32xf32>
    %237 = arith.mulf %236, %236 : vector<10x32xf32>
    %cst_78 = arith.constant dense<0.000000e+00> : vector<10xf32>
    %238 = vector.multi_reduction <add>, %237, %cst_78 [1] : vector<10x32xf32> to vector<10xf32>
    %239 = vector.shape_cast %238 : vector<10xf32> to vector<10x1xf32>
    %cst_79 = arith.constant 3.200000e+01 : f32
    %240 = vector.broadcast %cst_79 : f32 to vector<10x1xf32>
    %241 = arith.divf %239, %240 : vector<10x1xf32>
    %cst_80 = arith.constant 9.99999997E-7 : f32
    %242 = vector.broadcast %cst_80 : f32 to vector<10x1xf32>
    %243 = arith.addf %241, %242 : vector<10x1xf32>
    %244 = math.rsqrt %243 : vector<10x1xf32>
    %245 = vector.broadcast %244 : vector<10x1xf32> to vector<10x32xf32>
    %246 = arith.mulf %236, %245 : vector<10x32xf32>
    %247 = vector.broadcast %158 : vector<1x32xf32> to vector<10x32xf32>
    %248 = arith.mulf %246, %247 : vector<10x32xf32>
    %249 = vector.broadcast %159 : vector<1x32xf32> to vector<10x32xf32>
    %250 = arith.addf %248, %249 : vector<10x32xf32>
    %c5 = arith.constant 5 : index
    %c0_81 = arith.constant 0 : index
    %c0_82 = arith.constant 0 : index
    %251 = vector.load %arg2[%c5, %c0_81, %c0_82] : memref<7x32x96xf32, #tpu.memory_space<vmem>>, vector<1x32x96xf32>
    %252 = vector.shape_cast %251 : vector<1x32x96xf32> to vector<32x96xf32>
    %253 = vector.extract_strided_slice %252 {offsets = [0, 0], sizes = [32, 64], strides = [1, 1]} : vector<32x96xf32> to vector<32x64xf32>
    %cst_83 = arith.constant dense<0.000000e+00> : vector<10x64xf32>
    %254 = tpu.matmul %250, %253, %cst_83 {dimension_numbers = #tpu.dot_dimension_numbers<[1], [0], [0], [1], [0, 0, 1, 1], [], []>} : vector<10x32xf32>, vector<32x64xf32>, vector<10x64xf32> -> vector<10x64xf32>
    %255 = vector.broadcast %160 : vector<1x64xf32> to vector<10x64xf32>
    %256 = arith.addf %254, %255 : vector<10x64xf32>
    %cst_84 = arith.constant 5.000000e-01 : f32
    %257 = vector.broadcast %cst_84 : f32 to vector<10x64xf32>
    %258 = arith.mulf %257, %256 : vector<10x64xf32>
    %cst_85 = arith.constant 0.707106769 : f32
    %259 = vector.broadcast %cst_85 : f32 to vector<10x64xf32>
    %260 = arith.mulf %256, %259 : vector<10x64xf32>
    %261 = math.absf %260 : vector<10x64xf32>
    %cst_86 = arith.constant 0.327591091 : f32
    %262 = vector.broadcast %cst_86 : f32 to vector<10x64xf32>
    %263 = arith.mulf %262, %261 : vector<10x64xf32>
    %cst_87 = arith.constant 1.000000e+00 : f32
    %264 = vector.broadcast %cst_87 : f32 to vector<10x64xf32>
    %265 = arith.addf %264, %263 : vector<10x64xf32>
    %266 = tpu.reciprocal %265 {approx = true} : vector<10x64xf32> -> vector<10x64xf32>
    %cst_88 = arith.constant 1.06140542 : f32
    %267 = vector.broadcast %cst_88 : f32 to vector<10x64xf32>
    %268 = arith.mulf %267, %266 : vector<10x64xf32>
    %cst_89 = arith.constant -1.45315206 : f32
    %269 = vector.broadcast %cst_89 : f32 to vector<10x64xf32>
    %270 = arith.addf %268, %269 : vector<10x64xf32>
    %271 = arith.mulf %270, %266 : vector<10x64xf32>
    %cst_90 = arith.constant 1.42141378 : f32
    %272 = vector.broadcast %cst_90 : f32 to vector<10x64xf32>
    %273 = arith.addf %271, %272 : vector<10x64xf32>
    %274 = arith.mulf %273, %266 : vector<10x64xf32>
    %cst_91 = arith.constant -0.284496725 : f32
    %275 = vector.broadcast %cst_91 : f32 to vector<10x64xf32>
    %276 = arith.addf %274, %275 : vector<10x64xf32>
    %277 = arith.mulf %276, %266 : vector<10x64xf32>
    %cst_92 = arith.constant 0.254829586 : f32
    %278 = vector.broadcast %cst_92 : f32 to vector<10x64xf32>
    %279 = arith.addf %277, %278 : vector<10x64xf32>
    %280 = arith.mulf %279, %266 : vector<10x64xf32>
    %cst_93 = arith.constant 0.000000e+00 : f32
    %281 = vector.broadcast %cst_93 : f32 to vector<10x64xf32>
    %282 = arith.subf %281, %261 : vector<10x64xf32>
    %283 = arith.mulf %282, %261 : vector<10x64xf32>
    %284 = math.exp %283 : vector<10x64xf32>
    %285 = arith.mulf %280, %284 : vector<10x64xf32>
    %cst_94 = arith.constant 1.000000e+00 : f32
    %286 = vector.broadcast %cst_94 : f32 to vector<10x64xf32>
    %287 = arith.subf %286, %285 : vector<10x64xf32>
    %cst_95 = arith.constant 0.000000e+00 : f32
    %288 = vector.broadcast %cst_95 : f32 to vector<10x64xf32>
    %289 = arith.cmpf oge, %260, %288 : vector<10x64xf32>
    %cst_96 = arith.constant 0.000000e+00 : f32
    %290 = vector.broadcast %cst_96 : f32 to vector<10x64xf32>
    %291 = arith.subf %290, %287 : vector<10x64xf32>
    %292 = arith.select %289, %287, %291 : vector<10x64xi1>, vector<10x64xf32>
    %cst_97 = arith.constant 1.000000e+00 : f32
    %293 = vector.broadcast %cst_97 : f32 to vector<10x64xf32>
    %294 = arith.addf %293, %292 : vector<10x64xf32>
    %295 = arith.mulf %258, %294 : vector<10x64xf32>
    %296 = vector.broadcast %161 : vector<1x32xf32> to vector<10x32xf32>
    %297 = arith.addf %230, %296 : vector<10x32xf32>
    %c256 = arith.constant 256 : index
    %c0_98 = arith.constant 0 : index
    %298 = vector.load %arg3[%c256, %c0_98] : memref<320x32xf32, #tpu.memory_space<vmem>>, vector<64x32xf32>
    %cst_99 = arith.constant dense<0.000000e+00> : vector<10x32xf32>
    %299 = tpu.matmul %295, %298, %cst_99 {dimension_numbers = #tpu.dot_dimension_numbers<[1], [0], [0], [1], [0, 0, 1, 1], [], []>} : vector<10x64xf32>, vector<64x32xf32>, vector<10x32xf32> -> vector<10x32xf32>
    %300 = arith.addf %297, %299 : vector<10x32xf32>
    %c0_100 = arith.constant 0 : index
    %c0_101 = arith.constant 0 : index
    %301 = vector.load %arg7[%c0_100, %c0_101] : memref<2x10xf32, #tpu.memory_space<vmem>>, vector<2x10xf32>
    %cst_102 = arith.constant dense<0.000000e+00> : vector<2x32xf32>
    %302 = tpu.matmul %301, %300, %cst_102 {dimension_numbers = #tpu.dot_dimension_numbers<[1], [0], [0], [1], [0, 0, 1, 1], [], []>} : vector<2x10xf32>, vector<10x32xf32>, vector<2x32xf32> -> vector<2x32xf32>
    %303 = vector.extract_strided_slice %1 {offsets = [16, 0], sizes = [1, 32], strides = [1, 1]} : vector<19x96xf32> to vector<1x32xf32>
    %304 = vector.extract_strided_slice %1 {offsets = [17, 0], sizes = [1, 32], strides = [1, 1]} : vector<19x96xf32> to vector<1x32xf32>
    %cst_103 = arith.constant dense<0.000000e+00> : vector<2xf32>
    %305 = vector.multi_reduction <add>, %302, %cst_103 [1] : vector<2x32xf32> to vector<2xf32>
    %306 = vector.shape_cast %305 : vector<2xf32> to vector<2x1xf32>
    %cst_104 = arith.constant 3.200000e+01 : f32
    %307 = vector.broadcast %cst_104 : f32 to vector<2x1xf32>
    %308 = arith.divf %306, %307 : vector<2x1xf32>
    %309 = vector.broadcast %308 : vector<2x1xf32> to vector<2x32xf32>
    %310 = arith.subf %302, %309 : vector<2x32xf32>
    %311 = arith.mulf %310, %310 : vector<2x32xf32>
    %cst_105 = arith.constant dense<0.000000e+00> : vector<2xf32>
    %312 = vector.multi_reduction <add>, %311, %cst_105 [1] : vector<2x32xf32> to vector<2xf32>
    %313 = vector.shape_cast %312 : vector<2xf32> to vector<2x1xf32>
    %cst_106 = arith.constant 3.200000e+01 : f32
    %314 = vector.broadcast %cst_106 : f32 to vector<2x1xf32>
    %315 = arith.divf %313, %314 : vector<2x1xf32>
    %cst_107 = arith.constant 9.99999997E-7 : f32
    %316 = vector.broadcast %cst_107 : f32 to vector<2x1xf32>
    %317 = arith.addf %315, %316 : vector<2x1xf32>
    %318 = math.rsqrt %317 : vector<2x1xf32>
    %319 = vector.broadcast %318 : vector<2x1xf32> to vector<2x32xf32>
    %320 = arith.mulf %310, %319 : vector<2x32xf32>
    %321 = vector.broadcast %303 : vector<1x32xf32> to vector<2x32xf32>
    %322 = arith.mulf %320, %321 : vector<2x32xf32>
    %323 = vector.broadcast %304 : vector<1x32xf32> to vector<2x32xf32>
    %324 = arith.addf %322, %323 : vector<2x32xf32>
    %c6 = arith.constant 6 : index
    %c0_108 = arith.constant 0 : index
    %c0_109 = arith.constant 0 : index
    %325 = vector.load %arg2[%c6, %c0_108, %c0_109] : memref<7x32x96xf32, #tpu.memory_space<vmem>>, vector<1x32x96xf32>
    %326 = vector.shape_cast %325 : vector<1x32x96xf32> to vector<32x96xf32>
    %327 = vector.extract_strided_slice %326 {offsets = [0, 0], sizes = [32, 10], strides = [1, 1]} : vector<32x96xf32> to vector<32x10xf32>
    %cst_110 = arith.constant dense<0.000000e+00> : vector<2x10xf32>
    %328 = tpu.matmul %324, %327, %cst_110 {dimension_numbers = #tpu.dot_dimension_numbers<[1], [0], [0], [1], [0, 0, 1, 1], [], []>} : vector<2x32xf32>, vector<32x10xf32>, vector<2x10xf32> -> vector<2x10xf32>
    %329 = vector.extract_strided_slice %1 {offsets = [18, 0], sizes = [1, 10], strides = [1, 1]} : vector<19x96xf32> to vector<1x10xf32>
    %330 = vector.broadcast %329 : vector<1x10xf32> to vector<2x10xf32>
    %331 = arith.addf %328, %330 : vector<2x10xf32>
    %c0_111 = arith.constant 0 : index
    %c0_112 = arith.constant 0 : index
    %332 = vector.load %arg8[%c0_111, %c0_112] : memref<2x10xf32, #tpu.memory_space<vmem>>, vector<2x10xf32>
    tpu.vector_store %arg8[%c0_111, %c0_112], %331 {strides = array<i32>} : memref<2x10xf32, #tpu.memory_space<vmem>>, vector<2x10xf32>,
    return
  }
  func.func @transform_0(%arg0: i32) -> (i32, i32) {
    %c0_i32 = arith.constant 0 : i32
    %c0_i32_0 = arith.constant 0 : i32
    %c0_i32_1 = arith.constant 0 : i32
    return %c0_i32, %c0_i32_0 : i32, i32
  }
  func.func @transform_1(%arg0: i32) -> (i32, i32, i32) {
    %c0_i32 = arith.constant 0 : i32
    %c0_i32_0 = arith.constant 0 : i32
    %c0_i32_1 = arith.constant 0 : i32
    %c0_i32_2 = arith.constant 0 : i32
    return %c0_i32, %c0_i32_0, %c0_i32_1 : i32, i32, i32
  }
  func.func @transform_2(%arg0: i32) -> (i32, i32) {
    %c0_i32 = arith.constant 0 : i32
    %c0_i32_0 = arith.constant 0 : i32
    %c0_i32_1 = arith.constant 0 : i32
    return %c0_i32, %c0_i32_0 : i32, i32
  }
  func.func @transform_3(%arg0: i32) -> (i32, i32) {
    %c0_i32 = arith.constant 0 : i32
    %c0_i32_0 = arith.constant 0 : i32
    %c0_i32_1 = arith.constant 0 : i32
    return %c0_i32, %c0_i32_0 : i32, i32
  }
  func.func @transform_4(%arg0: i32) -> (i32, i32) {
    %c0_i32 = arith.constant 0 : i32
    %c0_i32_0 = arith.constant 0 : i32
    %c0_i32_1 = arith.constant 0 : i32
    return %c0_i32, %c0_i32_0 : i32, i32
  }
  func.func @transform_5(%arg0: i32) -> (i32, i32) {
    %c0_i32 = arith.constant 0 : i32
    %c0_i32_0 = arith.constant 0 : i32
    %c0_i32_1 = arith.constant 0 : i32
    return %c0_i32, %c0_i32_0 : i32, i32
  }
  func.func @transform_6(%arg0: i32) -> (i32, i32) {
    %c0_i32 = arith.constant 0 : i32
    %c0_i32_0 = arith.constant 0 : i32
    %c0_i32_1 = arith.constant 0 : i32
    return %c0_i32, %c0_i32_0 : i32, i32
  }
  func.func @transform_7(%arg0: i32) -> (i32, i32) {
    %c0_i32 = arith.constant 0 : i32
    %c0_i32_0 = arith.constant 0 : i32
    %c0_i32_1 = arith.constant 0 : i32
    return %c0_i32, %c0_i32_0 : i32, i32
  }
}

</mosaic_0001>

<bundles_post_ra>
// kernel: vit_forward.1
= control target key start
LH: loop header
LB: loop body
LE: loop exit
PB: predicated region body
PF: predicated region fallthrough
CT: control target
= control target key end

     0   :  { %v2835_v3 = vmov 0.0|0.0   ;;  %vm62_vm0 = vcmask 523264   ;;  %s3417_s0 = inlined_call_operand.vmem [shape: f32[10,192], index: 0, kind: input, shape index: {}]   ;;  %s3418_s1 = inlined_call_operand.vmem [shape: f32[7,32,96], index: 1, kind: input, shape index: {}]   ;;  %s3419_s2 = inlined_call_operand.vmem [shape: f32[320,32], index: 2, kind: input, shape index: {}]   ;;  %s3420_s3 = inlined_call_operand.vmem [shape: f32[19,96], index: 3, kind: input, shape index: {}]   ;;  %s3421_s4 = inlined_call_operand.vmem [shape: f32[10,32], index: 4, kind: input, shape index: {}]   ;;  %s3422_s5 = inlined_call_operand.vmem [shape: f32[10,10], index: 5, kind: input, shape index: {}]   ;;  %s3423_s6 = inlined_call_operand.vmem [shape: f32[2,10], index: 6, kind: input, shape index: {}]   ;;  %s3424_s7 = inlined_call_operand.hbm [shape: f32[2,10], index: 7, kind: output, shape index: {}]  }
   0x1   :  { %v32_v0 = vld [vmem:[%s3419_s2] sm:$0xff]  ;;  %v33_v1 = vld [vmem:[%s3419_s2 + $0x8] sm:$0xff]  ;;  %v34_v2 = vld [vmem:[%s3419_s2 + $0x10] sm:$0xff]  ;;  %2520 = vmatprep.subr.bf16.mxu0 %v2835_v3 }
   0x2   :  { %v2521_v4 = vpack.c.bf16 %v33_v1, %v32_v0  ;;  %v35_v5 = vld [vmem:[%s3419_s2 + $0x18] sm:$0xff]  ;;  %v36_v7 = vld [vmem:[%s3419_s2 + $0x20] sm:$0xff]  ;;  %v37_v8 = vld [vmem:[%s3419_s2 + $0x28] sm:$0xff] }
   0x3   :  { %v2524_v6 = vpack.c.bf16 %v35_v5, %v34_v2  ;;  %v2527_v9 = vpack.c.bf16 %v37_v8, %v36_v7  ;;  %v38_v10 = vld [vmem:[%s3419_s2 + $0x30] sm:$0xff]  ;;  %v39_v11 = vld [vmem:[%s3419_s2 + $0x38] sm:$0xff]  ;;  %v57_v12 = vld [vmem:[%s3417_s0 + $0x8] sm:$0xff] }
   0x4   :  { %2522 = vmatpush1.bf16.msra.mxu0 %v2521_v4  ;;  %2173 = vmatprep.mubr.msk.f32.mxu0 %vm62_vm0, %v57_v12 }
   0x5   :  { %2523 = vmatprep.subr.bf16.mxu0 %v2835_v3 }
   0x8   :  { %2525 = vmatpush1.bf16.msra.mxu0 %v2524_v6 }
   0x9   :  { %2526 = vmatprep.subr.bf16.mxu0 %v2835_v3 }
   0xa   :  { %12 = vsyncpa [#allocation3], 0  ;;  %v2530_v13 = vpack.c.bf16 %v39_v11, %v38_v10  ;;  %v40_v14 = vld [vmem:[%s3419_s2 + $0x40] sm:$0xff]  ;;  %v41_v15 = vld [vmem:[%s3419_s2 + $0x48] sm:$0xff]  ;;  %vm144_vm1 = vcmask 261120   ;;  %vm148_vm2 = vcmask 254976   ;;  %v173_v8 = vlaneseq }
   0xb   :  { %v2533_v16 = vpack.c.bf16 %v41_v15, %v40_v14  ;;  %v42_v17 = vld [vmem:[%s3419_s2 + $0x50] sm:$0xff]  ;;  %v43_v18 = vld [vmem:[%s3419_s2 + $0x58] sm:$0xff]  ;;  %v44_v20 = vld [vmem:[%s3419_s2 + $0x60] sm:$0xff]  ;;  %vm282_vm3 = vcmask 130048   ;;  %s2836_s23 = smov 96   ;;  %s2837_s24 = smov 80  }
   0xc   :  { %2528 = vmatpush1.bf16.msra.mxu0 %v2527_v9  ;;  %v2536_v19 = vpack.c.bf16 %v43_v18, %v42_v17  ;;  %v45_v21 = vld [vmem:[%s3419_s2 + $0x68] sm:$0xff]  ;;  %v46_v23 = vld [vmem:[%s3419_s2 + $0x70] sm:$0xff]  ;;  %v47_v24 = vld [vmem:[%s3419_s2 + $0x78] sm:$0xff]  ;;  %v3014_v11 = vshrl.u32 %v173_v8, 7  ;;  %s2838_s25 = smov 112   ;;  %vm368_vm5 = vcmask 80896  }
   0xd   :  { %2529 = vmatprep.subr.bf16.mxu0 %v2835_v3  ;;  %v2539_v22 = vpack.c.bf16 %v45_v21, %v44_v20  ;;  %v2542_v25 = vpack.c.bf16 %v47_v24, %v46_v23  ;;  %v48_v26 = vld [vmem:[%s3419_s2 + $0x80] sm:$0xff]  ;;  %v49_v27 = vld [vmem:[%s3419_s2 + $0x88] sm:$0xff]  ;;  %v50_v29 = vld [vmem:[%s3419_s2 + $0x90] sm:$0xff]  ;;  %vm372_vm6 = vcmask 74752   ;;  %vm403_vm7 = vcmask 1041408   ;;  %s2841_s30 = smov 48  }
   0xe   :  { %v2545_v28 = vpack.c.bf16 %v49_v27, %v48_v26  ;;  %v51_v30 = vld [vmem:[%s3419_s2 + $0x98] sm:$0xff]  ;;  %v52_v32 = vld [vmem:[%s3419_s2 + $0xa0] sm:$0xff]  ;;  %v53_v33 = vld [vmem:[%s3419_s2 + $0xa8] sm:$0xff]  ;;  %v3017_v12 = vsub.s32 0, %v3014_v11  ;;  %vm2840_vm8 = vmmov 1   ;;  %vm2843_vm14 = vmmov 0  }
   0xf   :  { %v2548_v31 = vpack.c.bf16 %v51_v30, %v50_v29  ;;  %v2551_v34 = vpack.c.bf16 %v53_v33, %v52_v32  ;;  %v54_v35 = vld [vmem:[%s3419_s2 + $0xb0] sm:$0xff]  ;;  %v55_v36 = vld [vmem:[%s3419_s2 + $0xb8] sm:$0xff]  ;;  %v56_v38 = vld [vmem:[%s3417_s0] sm:$0xff] }
  0x10   :  { %2531 = vmatpush1.bf16.msra.mxu0 %v2530_v13  ;;  %v2554_v37 = vpack.c.bf16 %v55_v36, %v54_v35  ;;  %v59_v39 = vld [vmem:[%s3417_s0 + $0x18] sm:$0x3]  ;;  %v58_v40 = vld [vmem:[%s3417_s0 + $0x10] sm:$0x3]  ;;  %v60_v41 = vld [vmem:[%s3421_s4] sm:$0xff]  ;;  %v3020_v13 = vsub.s32 1, %v3014_v11 }
  0x11   :  { %2532 = vmatprep.subr.bf16.mxu0 %v2835_v3  ;;  %v61_v45 = vld [vmem:[%s3421_s4 + $0x8] sm:$0x3]  ;;  %v185_v61 = vld [vmem:[%s3418_s1] sm:$0xff]  ;;  %v187_v63 = vld [vmem:[%s3418_s1 + $0x10] sm:$0xff]  ;;  %s2842_s4 = smov 16  }
  0x12   :  { %v186_v62 = vld [vmem:[%s3418_s1 + $0x8] sm:$0xff]  ;;  %v188_v1 = vld [vmem:[%s3418_s1 + $0x18] sm:$0xff]  ;;  %v3025_v14 = vld [vmem:[%s3420_s3] sm:$0xff] }
  0x13   :  { %v2556_v0 = vpack.c.bf16 %v186_v62, %v185_v61  ;;  %v2560_v2 = vpack.c.bf16 %v188_v1, %v187_v63  ;;  %v176_v15 = vrot.slane %v3025_v14, %v3017_v12  ;;  %v182_v18 = vrot.slane %v3025_v14, %v3020_v13  ;;  %vm3049_vm4 = vmpackc.low %vm282_vm3, %vm282_vm3 }
  0x14   :  { %2534 = vmatpush1.bf16.msra.mxu0 %v2533_v16  ;;  %vm3076_vm9 = vmpackc.low %vm403_vm7, %vm2840_vm8 }
  0x15   :  { %2535 = vmatprep.subr.bf16.mxu0 %v2835_v3  ;;  %2557 = vmatprep.subr.bf16.mxu1 %v2556_v0 }
  0x16   :  { %2559 = vmatpush3.bf16.msra.mxu1 %v2556_v0 }
  0x17   :  { %2561 = vmatprep.subr.bf16.mxu1 %v2560_v2 }
  0x18   :  { %2537 = vmatpush1.bf16.msra.mxu0 %v2536_v19 }
  0x19   :  { %2538 = vmatprep.subr.bf16.mxu0 %v2835_v3 }
  0x1a   :  { %2563 = vmatpush3.bf16.msra.mxu1 %v2560_v2 }
  0x1c   :  { %2540 = vmatpush1.bf16.msra.mxu0 %v2539_v22 }
  0x1d   :  { %2541 = vmatprep.subr.bf16.mxu0 %v2835_v3 }
  0x20   :  { %2543 = vmatpush1.bf16.msra.mxu0 %v2542_v25  ;;  %v3034_v25 = vsub.s32 2, %v3014_v11 }
  0x21   :  { %2544 = vmatprep.subr.bf16.mxu0 %v2835_v3 }
  0x22   :  { %v192_v26 = vrot.slane %v3025_v14, %v3034_v25 }
  0x24   :  { %2546 = vmatpush1.bf16.msra.mxu0 %v2545_v28 }
  0x25   :  { %2547 = vmatprep.subr.bf16.mxu0 %v2835_v3 }
  0x28   :  { %2549 = vmatpush1.bf16.msra.mxu0 %v2548_v31 }
  0x29   :  { %2550 = vmatprep.subr.bf16.mxu0 %v2835_v3 }
  0x2c   :  { %2552 = vmatpush1.bf16.msra.mxu0 %v2551_v34 }
  0x2d   :  { %2553 = vmatprep.subr.bf16.mxu0 %v2835_v3 }
  0x30   :  { %2555 = vmatpush1.bf16.msra.mxu0 %v2554_v37 }
  0x33   :  { %134 = vmatmul.mubr.f32.vlgmr.msra.gmra.mrb[0].mxu0 %v56_v38 }
  0x34   :  { %2174 = vmatprep.mubr.msk.f32.mxu0 %vm62_vm0, %v59_v39  ;;  %v3061_v39 = vld [vmem:[%s3422_s5] sm:$0xff] }
  0x37   :  { %139 = vmatmul.mubr.f32.gmra.mrb[2].mxu0 %v58_v40 }
 0x106   :  { %v135_v42 = vpop.f32.mrb[0].mxu0 }
 0x107   :  { %v2987_v43 = vadd.f32 %v135_v42, %v60_v41  ;;  %v137_v44 = vpop.f32.mrb[1].mxu0  ;;  %v3066_v41 = vld [vmem:[%s3422_s5 + $0x8] sm:$0x3]  ;;  %s2839_s5 = smov 64  }
 0x109   :  { %v145_v46 = vsel %vm144_vm1, %v2987_v43, 0.0 }
 0x10a   :  { %v140_v47 = vpop.f32.mrb[2].mxu0  ;;  %146 = vadd.xlane.f32.xlu0 %v145_v46 }
 0x10b   :  { %v2994_v48 = vadd.f32 %v140_v47, %v61_v45  ;;  %v142_v49 = vpop.f32.mrb[3].mxu0 }
 0x10d   :  { %v149_v50 = vsel %vm148_vm2, %v2994_v48, 0.0 }
 0x10e   :  { %150 = vadd.xlane.f32.xlu0 %v149_v50 }
 0x197   :  { %v147_v51 = vpop.xlane.xlu0 %146 }
 0x198   :  { %v153_v52 = vmul.f32 0.03125, %v147_v51 }
 0x19a   :  { %v155_v53 = vsub.f32 %v2987_v43, %v153_v52 }
 0x19b   :  { %v151_v54 = vpop.xlane.xlu0 %150 }
 0x19c   :  { %v154_v55 = vmul.f32 0.03125, %v151_v54  ;;  %v157_v56 = vmul.f32 %v155_v53, %v155_v53 }
 0x19e   :  { %v156_v57 = vsub.f32 %v2994_v48, %v154_v55  ;;  %v159_v58 = vsel %vm144_vm1, %v157_v56, 0.0 }
 0x19f   :  { %160 = vadd.xlane.f32.xlu1 %v159_v58 }
 0x1a0   :  { %v158_v59 = vmul.f32 %v156_v57, %v156_v57 }
 0x1a2   :  { %v162_v60 = vsel %vm148_vm2, %v158_v59, 0.0 }
 0x1a3   :  { %163 = vadd.xlane.f32.xlu1 %v162_v60 }
 0x22c   :  { %v161_v4 = vpop.xlane.xlu1 %160 }
 0x22d   :  { %v165_v5 = vmul.f32 0.03125, %v161_v4 }
 0x22f   :  { %v167_v6 = vadd.f32 1e-06, %v165_v5 }
 0x230   :  { %v164_v7 = vpop.xlane.xlu1 %163 }
 0x231   :  { %2745 = vrsqrt.f32 %v167_v6  ;;  %v166_v9 = vmul.f32 0.03125, %v164_v7 }
 0x233   :  { %v168_v10 = vadd.f32 1e-06, %v166_v9 }
 0x235   :  { %2747 = vrsqrt.f32 %v168_v10 }
 0x23b   :  { %v2746_v16 = vpop.eup %2745 }
 0x23c   :  { %v171_v17 = vmul.f32 %v2746_v16, %v155_v53 }
 0x23e   :  { %v177_v19 = vmul.f32 %v176_v15, %v171_v17 }
 0x23f   :  { %v2748_v20 = vpop.eup %2747 }
 0x240   :  { %v172_v21 = vmul.f32 %v2748_v20, %v156_v57  ;;  %v183_v22 = vadd.f32 %v182_v18, %v177_v19 }
 0x242   :  { %v178_v23 = vmul.f32 %v176_v15, %v172_v21  ;;  %2350 = vmatprep.mubr.msk.f32.mxu1 %vm144_vm1, %v183_v22 }
 0x244   :  { %v184_v24 = vadd.f32 %v182_v18, %v178_v23 }
 0x246   :  { %2351 = vmatmul.mubr.msk.f32.vlgmr.msra.gmra.mrb[0].mxu1 %vm144_vm1, %v184_v24 }
 0x319   :  { %v2352_v27 = vpop.f32.mrb[0].mxu1 }
 0x31a   :  { %v271_v28 = vadd.f32 %v2352_v27, %v192_v26  ;;  %v265_v29 = vpop.f32.mrb[1].mxu1 }
 0x31b   :  { %v266_v30 = vadd.f32 %v265_v29, %v192_v26 }
 0x31c   :  { %v275_v33 = vmul.f32 0.25, %v271_v28 }
 0x31d   :  { %v3038_v31 = vpack.i.bf16 %v271_v28, %v266_v30  ;;  %v274_v32 = vmul.f32 0.25, %v266_v30 }
 0x31f   :  { %2706 = vrot.lane.b32.xlu0 %v3038_v31, %s2836_s23  ;;  %2357 = vmatprep.mubr.msk.f32.mxu1 %vm282_vm3, %v274_v32 }
 0x323   :  { %2716 = vrot.lane.b32.xlu0 %v3038_v31, %s2837_s24 }
 0x327   :  { %481 = vrot.lane.b32.xlu0 %v274_v32, %s2838_s25 }
 0x32b   :  { %483 = vrot.lane.b32.xlu0 %v275_v33, %s2838_s25 }
 0x391   :  { %v2707_v34 = vpop.permute.xlu0 %2706 }
 0x392   :  { %v2709_v35 = vunpack.i.h.bf16 %v2707_v34  ;;  %v2708_v36 = vunpack.i.l.bf16 %v2707_v34 }
 0x394   :  { %v2564_v38 = vpack.c.bf16 %v2709_v35, %v2708_v36 }
 0x395   :  { %v2717_v61 = vpop.permute.xlu0 %2716 }
 0x396   :  { %2566 = vmatprep.subr.msk.bf16.mxu1 %vm3049_vm4, %v2564_v38  ;;  %v2719_v63 = vunpack.i.h.bf16 %v2717_v61  ;;  %v2718_v0 = vunpack.i.l.bf16 %v2717_v61 }
 0x397   :  { %2569 = vmatpush3.bf16.xpose.msk.msra.mxu1 %vm3049_vm4, %v2564_v38 }
 0x398   :  { %v2576_v6 = vpack.c.bf16 %v2719_v63, %v2718_v0  ;;  %v694_v63 = vsub.s32 3, %v3014_v11 }
 0x399   :  { %v482_v15 = vpop.permute.xlu0 %481 }
 0x39a   :  { %v695_v0 = vrot.slane %v3025_v14, %v694_v63 }
 0x39d   :  { %v484_v16 = vpop.permute.xlu0 %483 }
 0x39e   :  { %2358 = vmatmul.mubr.msk.f32.vlgmr.msra.gmra.mrb[2].mxu1 %vm282_vm3, %v275_v33 }
 0x471   :  { %v2359_v40 = vpop.f32.mrb[2].mxu1 }
 0x472   :  { %v359_v42 = vpop.f32.mrb[3].mxu1  ;;  %v365_v45 = vadd.f32 %v2359_v40, %v3066_v41 }
 0x473   :  { %v360_v44 = vadd.f32 %v359_v42, %v3061_v39 }
 0x474   :  { %v373_v47 = vsel %vm372_vm6, %v365_v45, -inf }
 0x475   :  { %v369_v46 = vsel %vm368_vm5, %v360_v44, -inf }
 0x476   :  { %370 = vmax.xlane.f32.xlu1 %v369_v46 }
 0x47a   :  { %374 = vmax.xlane.f32.xlu1 %v373_v47 }
 0x503   :  { %v371_v49 = vpop.xlane.xlu1 %370 }
 0x504   :  { %v376_v50 = vsub.f32 %v360_v44, %v371_v49 }
 0x506   :  { %v378_v53 = vmul.f32 1.442695, %v376_v50 }
 0x507   :  { %v375_v51 = vpop.xlane.xlu1 %374 }
 0x508   :  { %v377_v52 = vsub.f32 %v365_v45, %v375_v51  ;;  %v2191_v51 = vld [vmem:[%s3418_s1 + $0x20] sm:$0xff] }
 0x50a   :  { %v380_v54 = vmul.f32 1.442695, %v377_v52  ;;  %v2192_v52 = vld [vmem:[%s3418_s1 + $0x28] sm:$0xff] }
 0x50c   :  { %2749 = vpow2.f32 %v380_v54  ;;  %v2588_v54 = vpack.c.bf16 %v2192_v52, %v2191_v51 }
 0x50d   :  { %2751 = vpow2.f32 %v378_v53  ;;  %v2193_v53 = vld [vmem:[%s3418_s1 + $0x30] sm:$0xff] }
 0x516   :  { %v2750_v55 = vpop.eup %2749 }
 0x517   :  { %v385_v56 = vsel %vm372_vm6, %v2750_v55, 0.0  ;;  %v2752_v57 = vpop.eup %2751 }
 0x518   :  { %386 = vadd.xlane.f32.xlu1 %v385_v56  ;;  %v382_v58 = vsel %vm368_vm5, %v2752_v57, 0.0 }
 0x51c   :  { %383 = vadd.xlane.f32.xlu1 %v382_v58 }
 0x52d   :  { %2711 = vrot.lane.b32.xlu1 %v3038_v31, %s2839_s5 }
 0x5a5   :  { %v387_v59 = vpop.xlane.xlu1 %386 }
 0x5a6   :  { %2753 = vrcp.f32 %v387_v59 }
 0x5a9   :  { %v384_v60 = vpop.xlane.xlu1 %383 }
 0x5aa   :  { %2755 = vrcp.f32 %v384_v60 }
 0x5ad   :  { %v2712_v62 = vpop.permute.xlu1 %2711 }
 0x5ae   :  { %v2714_v1 = vunpack.i.h.bf16 %v2712_v62  ;;  %v2713_v2 = vunpack.i.l.bf16 %v2712_v62 }
 0x5b0   :  { %v2570_v5 = vpack.c.bf16 %v2714_v1, %v2713_v2  ;;  %v2754_v7 = vpop.eup %2753  ;;  %v697_v1 = vadd.f32 %v695_v0, %v2994_v48 }
 0x5b1   :  { %v391_v10 = vmul.f32 %v2754_v7, %v2750_v55  ;;  %v2194_v55 = vld [vmem:[%s3418_s1 + $0x38] sm:$0xff] }
 0x5b2   :  { %2572 = vmatprep.subr.msk.bf16.mxu1 %vm3076_vm9, %v2570_v5  ;;  %v2592_v56 = vpack.c.bf16 %v2194_v55, %v2193_v53  ;;  %v972_v53 = vld [vmem:[%s3419_s2 + $0xc0] sm:$0xff] }
 0x5b3   :  { %2575 = vmatpush3.bf16.msk.msra.mxu1 %vm3076_vm9, %v2570_v5  ;;  %v696_v5 = vadd.f32 %v695_v0, %v2987_v43  ;;  %v979_v0 = vld [vmem:[%s3419_s2 + $0xf8] sm:$0xff] }
 0x5b4   :  { %v2756_v8 = vpop.eup %2755  ;;  %2578 = vmatprep.subr.msk.bf16.mxu1 %vm3049_vm4, %v2576_v6 }
 0x5b5   :  { %v390_v9 = vmul.f32 %v2756_v8, %v2752_v57 }
 0x5b7   :  { %2364 = vmatprep.mubr.msk.f32.mxu1 %vm368_vm5, %v390_v9 }
 0x5b8   :  { %2365 = vmatmul.mubr.msk.f32.vlgmr.msra.gmra.mrb[4].mxu1 %vm368_vm5, %v391_v10 }
 0x5b9   :  { %2371 = vmatprep.mubr.msk.f32.mxu1 %vm282_vm3, %v482_v15 }
 0x5bc   :  { %2581 = vmatpush3.bf16.xpose.msk.msra.mxu1 %vm3049_vm4, %v2576_v6 }
 0x5c3   :  { %2372 = vmatmul.mubr.msk.f32.vlgmr.msra.gmra.mrb[6].mxu1 %vm282_vm3, %v484_v16 }
 0x68b   :  { %v2366_v17 = vpop.f32.mrb[4].mxu1 }
 0x68c   :  { %v472_v18 = vpop.f32.mrb[5].mxu1 }
 0x696   :  { %v2373_v19 = vpop.f32.mrb[6].mxu1 }
 0x697   :  { %v569_v20 = vadd.f32 %v2373_v19, %v3066_v41  ;;  %v563_v21 = vpop.f32.mrb[7].mxu1 }
 0x698   :  { %v564_v22 = vadd.f32 %v563_v21, %v3061_v39 }
 0x699   :  { %v575_v23 = vsel %vm372_vm6, %v569_v20, -inf }
 0x69a   :  { %576 = vmax.xlane.f32.xlu0 %v575_v23  ;;  %v572_v24 = vsel %vm368_vm5, %v564_v22, -inf  ;;  %v2197_v23 = vld [vmem:[%s3418_s1 + $0x40] sm:$0xff] }
 0x69b   :  { %573 = vmax.xlane.f32.xlu1 %v572_v24  ;;  %v2198_v24 = vld [vmem:[%s3418_s1 + $0x48] sm:$0xff] }
 0x6ac   :  { %2721 = vrot.lane.b32.xlu1 %v3038_v31, %s2841_s30 }
 0x727   :  { %v577_v26 = vpop.xlane.xlu0 %576 }
 0x728   :  { %v579_v27 = vsub.f32 %v569_v20, %v577_v26  ;;  %v574_v28 = vpop.xlane.xlu1 %573  ;;  %v2596_v26 = vpack.c.bf16 %v2198_v24, %v2197_v23 }
 0x729   :  { %v578_v29 = vsub.f32 %v564_v22, %v574_v28  ;;  %v2200_v28 = vld [vmem:[%s3418_s1 + $0x58] sm:$0xff] }
 0x72a   :  { %v582_v30 = vmul.f32 1.442695, %v579_v27  ;;  %v2199_v27 = vld [vmem:[%s3418_s1 + $0x50] sm:$0xff] }
 0x72b   :  { %v580_v32 = vmul.f32 1.442695, %v578_v29  ;;  %v2600_v29 = vpack.c.bf16 %v2200_v28, %v2199_v27 }
 0x72c   :  { %v2722_v33 = vpop.permute.xlu1 %2721 }
 0x72d   :  { %2757 = vpow2.f32 %v580_v32  ;;  %v2724_v34 = vunpack.i.h.bf16 %v2722_v33  ;;  %v2723_v35 = vunpack.i.l.bf16 %v2722_v33 }
 0x72e   :  { %2759 = vpow2.f32 %v582_v30 }
 0x72f   :  { %v2582_v36 = vpack.c.bf16 %v2724_v34, %v2723_v35 }
 0x731   :  { %2584 = vmatprep.subr.msk.bf16.mxu1 %vm3076_vm9, %v2582_v36 }
 0x732   :  { %2587 = vmatpush3.bf16.msk.msra.mxu1 %vm3076_vm9, %v2582_v36 }
 0x733   :  { %2589 = vmatprep.subr.bf16.mxu1 %v2588_v54 }
 0x737   :  { %v2758_v38 = vpop.eup %2757 }
 0x738   :  { %v584_v31 = vsel %vm368_vm5, %v2758_v38, 0.0  ;;  %v2760_v40 = vpop.eup %2759 }
 0x739   :  { %585 = vadd.xlane.f32.xlu0 %v584_v31  ;;  %v587_v42 = vsel %vm372_vm6, %v2760_v40, 0.0  ;;  %v820_v31 = vsub.s32 5, %v3014_v11 }
 0x73d   :  { %588 = vadd.xlane.f32.xlu0 %v587_v42 }
 0x7c6   :  { %v586_v44 = vpop.xlane.xlu0 %585 }
 0x7c7   :  { %2761 = vrcp.f32 %v586_v44 }
 0x7ca   :  { %v589_v45 = vpop.xlane.xlu0 %588 }
 0x7cb   :  { %2763 = vrcp.f32 %v589_v45 }
 0x7d1   :  { %v2762_v46 = vpop.eup %2761 }
 0x7d2   :  { %v592_v47 = vmul.f32 %v2762_v46, %v2758_v38  ;;  %v814_v38 = vsub.s32 4, %v3014_v11 }
 0x7d4   :  { %2378 = vmatprep.mubr.msk.f32.mxu1 %vm368_vm5, %v592_v47  ;;  %v821_v47 = vrot.slane %v3025_v14, %v820_v31 }
 0x7d5   :  { %v2764_v49 = vpop.eup %2763 }
 0x7d6   :  { %v593_v50 = vmul.f32 %v2764_v49, %v2760_v40  ;;  %v815_v40 = vrot.slane %v3025_v14, %v814_v38 }
 0x7d8   :  { %2379 = vmatmul.mubr.msk.f32.vlgmr.msra.gmra.mrb[8].mxu1 %vm368_vm5, %v593_v50 }
 0x7d9   :  { %2591 = vmatpush3.bf16.msra.mxu1 %v2588_v54  ;;  %v973_v54 = vld [vmem:[%s3419_s2 + $0xc8] sm:$0xff] }
 0x7da   :  { %2593 = vmatprep.subr.bf16.mxu1 %v2592_v56  ;;  %v2604_v55 = vpack.c.bf16 %v973_v54, %v972_v53 }
 0x7dc   :  { %2605 = vmatprep.subr.bf16.mxu0 %v2604_v55 }
 0x7dd   :  { %2595 = vmatpush3.bf16.msra.mxu1 %v2592_v56  ;;  %2607 = vmatpush3.bf16.msra.mxu0 %v2604_v55  ;;  %v974_v56 = vld [vmem:[%s3419_s2 + $0xd0] sm:$0xff] }
 0x7de   :  { %2597 = vmatprep.subr.bf16.mxu1 %v2596_v26 }
 0x8ab   :  { %v2380_v57 = vpop.f32.mrb[8].mxu1 }
 0x8ac   :  { %686 = vrot.lane.b32.xlu1 %v2380_v57, %s2842_s4  ;;  %v673_v58 = vpop.f32.mrb[9].mxu1  ;;  %v975_v57 = vld [vmem:[%s3419_s2 + $0xd8] sm:$0xff] }
 0x8ad   :  { %684 = vrot.lane.b32.xlu0 %v673_v58, %s2842_s4  ;;  %v2608_v58 = vpack.c.bf16 %v975_v57, %v974_v56 }
 0x8af   :  { %2609 = vmatprep.subr.bf16.mxu0 %v2608_v58 }
 0x8b0   :  { %2611 = vmatpush3.bf16.msra.mxu0 %v2608_v58 }
 0x91e   :  { %v687_v59 = vpop.permute.xlu1 %686 }
 0x91f   :  { %v685_v60 = vpop.permute.xlu0 %684  ;;  %v691_v62 = vsel %vm282_vm3, %v2366_v17, %v687_v59  ;;  %v976_v59 = vld [vmem:[%s3419_s2 + $0xe0] sm:$0xff] }
 0x920   :  { %v690_v61 = vsel %vm282_vm3, %v472_v18, %v685_v60  ;;  %v977_v60 = vld [vmem:[%s3419_s2 + $0xe8] sm:$0xff] }
 0x921   :  { %2389 = vmatprep.mubr.msk.f32.mxu1 %vm144_vm1, %v690_v61  ;;  %v2612_v61 = vpack.c.bf16 %v977_v60, %v976_v59 }
 0x922   :  { %2390 = vmatmul.mubr.msk.f32.vlgmr.msra.gmra.mrb[10].mxu1 %vm144_vm1, %v691_v62  ;;  %v978_v62 = vld [vmem:[%s3419_s2 + $0xf0] sm:$0xff] }
 0x923   :  { %2599 = vmatpush3.bf16.msra.mxu1 %v2596_v26  ;;  %2613 = vmatprep.subr.bf16.mxu0 %v2612_v61 }
 0x924   :  { %2601 = vmatprep.subr.bf16.mxu1 %v2600_v29  ;;  %2615 = vmatpush3.bf16.msra.mxu0 %v2612_v61 }
 0x927   :  { %2603 = vmatpush3.bf16.msra.mxu1 %v2600_v29 }
 0x9f5   :  { %v2391_v2 = vpop.f32.mrb[10].mxu1 }
 0x9f6   :  { %v3130_v6 = vadd.f32 %v2391_v2, %v697_v1  ;;  %v775_v7 = vpop.f32.mrb[11].mxu1  ;;  %v2616_v1 = vpack.c.bf16 %v979_v0, %v978_v62  ;;  %v831_v2 = vsub.s32 6, %v3014_v11 }
 0x9f7   :  { %v3132_v8 = vadd.f32 %v775_v7, %v696_v5 }
 0x9f8   :  { %v789_v9 = vsel %vm148_vm2, %v3130_v6, 0.0  ;;  %2617 = vmatprep.subr.bf16.mxu0 %v2616_v1  ;;  %v832_v5 = vrot.slane %v3025_v14, %v831_v2 }
 0x9f9   :  { %790 = vadd.xlane.f32.xlu0 %v789_v9  ;;  %v786_v10 = vsel %vm144_vm1, %v3132_v8, 0.0  ;;  %2619 = vmatpush3.bf16.msra.mxu0 %v2616_v1 }
 0x9fa   :  { %787 = vadd.xlane.f32.xlu1 %v786_v10 }
 0xa86   :  { %v791_v15 = vpop.xlane.xlu0 %790 }
 0xa87   :  { %v793_v16 = vmul.f32 0.03125, %v791_v15  ;;  %v788_v17 = vpop.xlane.xlu1 %787 }
 0xa88   :  { %v792_v48 = vmul.f32 0.03125, %v788_v17 }
 0xa89   :  { %v795_v18 = vsub.f32 %v3130_v6, %v793_v16 }
 0xa8a   :  { %v794_v43 = vsub.f32 %v3132_v8, %v792_v48 }
 0xa8b   :  { %v797_v19 = vmul.f32 %v795_v18, %v795_v18 }
 0xa8c   :  { %v796_v20 = vmul.f32 %v794_v43, %v794_v43 }
 0xa8d   :  { %v801_v21 = vsel %vm148_vm2, %v797_v19, 0.0 }
 0xa8e   :  { %802 = vadd.xlane.f32.xlu1 %v801_v21  ;;  %v798_v22 = vsel %vm144_vm1, %v796_v20, 0.0 }
 0xa8f   :  { %799 = vadd.xlane.f32.xlu0 %v798_v22 }
 0xb1b   :  { %v803_v30 = vpop.xlane.xlu1 %802 }
 0xb1c   :  { %v805_v32 = vmul.f32 0.03125, %v803_v30  ;;  %v800_v33 = vpop.xlane.xlu0 %799 }
 0xb1d   :  { %v804_v34 = vmul.f32 0.03125, %v800_v33 }
 0xb1e   :  { %v807_v35 = vadd.f32 1e-06, %v805_v32 }
 0xb1f   :  { %v806_v36 = vadd.f32 1e-06, %v804_v34 }
 0xb20   :  { %2765 = vrsqrt.f32 %v807_v35 }
 0xb21   :  { %2767 = vrsqrt.f32 %v806_v36 }
 0xb2a   :  { %v2766_v42 = vpop.eup %2765 }
 0xb2b   :  { %v2768_v44 = vpop.eup %2767  ;;  %v811_v45 = vmul.f32 %v2766_v42, %v795_v18 }
 0xb2c   :  { %v810_v46 = vmul.f32 %v2768_v44, %v794_v43 }
 0xb2d   :  { %v817_v49 = vmul.f32 %v815_v40, %v811_v45 }
 0xb2e   :  { %v816_v50 = vmul.f32 %v815_v40, %v810_v46 }
 0xb2f   :  { %v823_v52 = vadd.f32 %v821_v47, %v817_v49 }
 0xb30   :  { %v822_v51 = vadd.f32 %v821_v47, %v816_v50 }
 0xb32   :  { %2400 = vmatprep.mubr.msk.f32.mxu1 %vm144_vm1, %v822_v51 }
 0xb33   :  { %2401 = vmatmul.mubr.msk.f32.vlgmr.msra.gmra.mrb[12].mxu1 %vm144_vm1, %v823_v52 }
 0xc06   :  { %v2402_v7 = vpop.f32.mrb[12].mxu1 }
 0xc07   :  { %v911_v9 = vadd.f32 %v2402_v7, %v832_v5  ;;  %v905_v10 = vpop.f32.mrb[13].mxu1 }
 0xc08   :  { %v906_v15 = vadd.f32 %v905_v10, %v832_v5 }
 0xc09   :  { %v917_v16 = vmul.f32 0.70710677, %v911_v9 }
 0xc0a   :  { %v916_v17 = vmul.f32 0.70710677, %v906_v15  ;;  %v914_v10 = vmul.f32 0.5, %v906_v15 }
 0xc0b   :  { %v919_v48 = vand.u32 2147483647, %v917_v16  ;;  %vm957_vm10 = vcmp.ge.f32.partialorder %v917_v16, 0.0 }
 0xc0c   :  { %v918_v18 = vand.u32 2147483647, %v916_v17  ;;  %vm956_vm11 = vcmp.ge.f32.partialorder %v916_v17, 0.0 }
 0xc0d   :  { %v921_v43 = vmul.f32 0.3275911, %v919_v48  ;;  %v945_v22 = vsub.f32 0.0, %v919_v48 }
 0xc0e   :  { %v920_v19 = vmul.f32 0.3275911, %v918_v18  ;;  %v944_v23 = vsub.f32 0.0, %v918_v18 }
 0xc0f   :  { %v923_v20 = vadd.f32 1.0, %v921_v43  ;;  %v947_v26 = vmul.f32 %v945_v22, %v919_v48 }
 0xc10   :  { %v922_v21 = vadd.f32 1.0, %v920_v19  ;;  %v946_v29 = vmul.f32 %v944_v23, %v918_v18  ;;  %v915_v18 = vmul.f32 0.5, %v911_v9 }
 0xc11   :  { %2769 = vrcp.f32 %v923_v20  ;;  %v950_v33 = vmul.f32 1.442695, %v947_v26  ;;  %v968_v20 = vsub.s32 7, %v3014_v11 }
 0xc12   :  { %2771 = vrcp.f32 %v922_v21  ;;  %v948_v36 = vmul.f32 1.442695, %v946_v29 }
 0xc13   :  { %2773 = vpow2.f32 %v950_v33  ;;  %v969_v16 = vrot.slane %v3025_v14, %v968_v20 }
 0xc14   :  { %2775 = vpow2.f32 %v948_v36  ;;  %v2206_v36 = vld [vmem:[%s3418_s1 + $0x68] sm:$0xff] }
 0xc15   :  { %v971_v21 = vadd.f32 %v969_v16, %v3130_v6  ;;  %v970_v22 = vadd.f32 %v969_v16, %v3132_v8 }
 0xc1b   :  { %v2770_v24 = vpop.eup %2769 }
 0xc1c   :  { %v2772_v27 = vpop.eup %2771  ;;  %v927_v28 = vmul.f32 1.0614054, %v2770_v24 }
 0xc1d   :  { %v926_v30 = vmul.f32 1.0614054, %v2772_v27  ;;  %v2774_v55 = vpop.eup %2773 }
 0xc1e   :  { %v929_v32 = vadd.f32 -1.4531521, %v927_v28  ;;  %v2776_v57 = vpop.eup %2775 }
 0xc1f   :  { %v928_v34 = vadd.f32 -1.4531521, %v926_v30 }
 0xc20   :  { %v931_v35 = vmul.f32 %v2770_v24, %v929_v32 }
 0xc21   :  { %v930_v40 = vmul.f32 %v2772_v27, %v928_v34 }
 0xc22   :  { %v933_v42 = vadd.f32 1.4214138, %v931_v35  ;;  %v2205_v35 = vld [vmem:[%s3418_s1 + $0x60] sm:$0xff] }
 0xc23   :  { %v932_v44 = vadd.f32 1.4214138, %v930_v40  ;;  %v2620_v40 = vpack.c.bf16 %v2206_v36, %v2205_v35 }
 0xc24   :  { %v935_v45 = vmul.f32 %v2770_v24, %v933_v42  ;;  %v2207_v42 = vld [vmem:[%s3418_s1 + $0x70] sm:$0xff] }
 0xc25   :  { %v934_v46 = vmul.f32 %v2772_v27, %v932_v44  ;;  %v2208_v44 = vld [vmem:[%s3418_s1 + $0x78] sm:$0xff]  ;;  %2621 = vmatprep.subr.bf16.mxu1 %v2620_v40 }
 0xc26   :  { %v937_v47 = vadd.f32 -0.28449672, %v935_v45  ;;  %v2624_v45 = vpack.c.bf16 %v2208_v44, %v2207_v42  ;;  %2623 = vmatpush3.bf16.msra.mxu1 %v2620_v40 }
 0xc27   :  { %v936_v49 = vadd.f32 -0.28449672, %v934_v46 }
 0xc28   :  { %v939_v50 = vmul.f32 %v2770_v24, %v937_v47  ;;  %2625 = vmatprep.subr.bf16.mxu1 %v2624_v45 }
 0xc29   :  { %v938_v51 = vmul.f32 %v2772_v27, %v936_v49 }
 0xc2a   :  { %v941_v52 = vadd.f32 0.2548296, %v939_v50  ;;  %2627 = vmatpush3.bf16.msra.mxu1 %v2624_v45 }
 0xc2b   :  { %v940_v53 = vadd.f32 0.2548296, %v938_v51 }
 0xc2c   :  { %v943_v54 = vmul.f32 %v2770_v24, %v941_v52 }
 0xc2d   :  { %v942_v56 = vmul.f32 %v2772_v27, %v940_v53  ;;  %v3227_v53 = vld [vmem:[%s3420_s3 + $0x8] sm:$0xff] }
 0xc2e   :  { %v953_v58 = vmul.f32 %v2774_v55, %v943_v54  ;;  %v1092_v54 = vrot.slane %v3227_v53, %v3017_v12 }
 0xc2f   :  { %v952_v59 = vmul.f32 %v2776_v57, %v942_v56 }
 0xc30   :  { %v955_v60 = vsub.f32 1.0, %v953_v58 }
 0xc31   :  { %v954_v61 = vsub.f32 1.0, %v952_v59  ;;  %v1098_v59 = vrot.slane %v3227_v53, %v3020_v13 }
 0xc32   :  { %v959_v62 = vsub.f32 0.0, %v955_v60 }
 0xc33   :  { %v958_v0 = vsub.f32 0.0, %v954_v61 }
 0xc34   :  { %v961_v1 = vsel %vm957_vm10, %v955_v60, %v959_v62 }
 0xc35   :  { %v963_v5 = vadd.f32 1.0, %v961_v1  ;;  %v960_v7 = vsel %vm956_vm11, %v954_v61, %v958_v0  ;;  %v1109_v1 = vrot.slane %v3227_v53, %v3034_v25 }
 0xc36   :  { %v962_v48 = vadd.f32 1.0, %v960_v7 }
 0xc37   :  { %v965_v19 = vmul.f32 %v963_v5, %v915_v18 }
 0xc38   :  { %v964_v43 = vmul.f32 %v962_v48, %v914_v10 }
 0xc3a   :  { %2419 = vmatprep.mubr.msk.f32.mxu0 %vm62_vm0, %v964_v43 }
 0xc3b   :  { %2420 = vmatmul.mubr.msk.f32.vlgmr.msra.gmra.mrb[4].mxu0 %vm62_vm0, %v965_v19 }
 0xd0e   :  { %v2421_v17 = vpop.f32.mrb[4].mxu0 }
 0xd0f   :  { %v3200_v15 = vadd.f32 %v2421_v17, %v971_v21  ;;  %v1052_v9 = vpop.f32.mrb[5].mxu0 }
 0xd10   :  { %v3202_v23 = vadd.f32 %v1052_v9, %v970_v22 }
 0xd11   :  { %v1066_v24 = vsel %vm148_vm2, %v3200_v15, 0.0 }
 0xd12   :  { %1067 = vadd.xlane.f32.xlu1 %v1066_v24  ;;  %v1063_v26 = vsel %vm144_vm1, %v3202_v23, 0.0 }
 0xd13   :  { %1064 = vadd.xlane.f32.xlu0 %v1063_v26 }
 0xd9f   :  { %v1068_v27 = vpop.xlane.xlu1 %1067 }
 0xda0   :  { %v1070_v14 = vmul.f32 0.03125, %v1068_v27  ;;  %v1065_v28 = vpop.xlane.xlu0 %1064 }
 0xda1   :  { %v1069_v6 = vmul.f32 0.03125, %v1065_v28 }
 0xda2   :  { %v1072_v29 = vsub.f32 %v3200_v15, %v1070_v14 }
 0xda3   :  { %v1071_v8 = vsub.f32 %v3202_v23, %v1069_v6 }
 0xda4   :  { %v1074_v30 = vmul.f32 %v1072_v29, %v1072_v29 }
 0xda5   :  { %v1073_v32 = vmul.f32 %v1071_v8, %v1071_v8 }
 0xda6   :  { %v1078_v33 = vsel %vm148_vm2, %v1074_v30, 0.0 }
 0xda7   :  { %1079 = vadd.xlane.f32.xlu1 %v1078_v33  ;;  %v1075_v34 = vsel %vm144_vm1, %v1073_v32, 0.0 }
 0xda8   :  { %1076 = vadd.xlane.f32.xlu0 %v1075_v34 }
 0xe34   :  { %v1080_v46 = vpop.xlane.xlu1 %1079 }
 0xe35   :  { %v1082_v47 = vmul.f32 0.03125, %v1080_v46  ;;  %v1077_v49 = vpop.xlane.xlu0 %1076 }
 0xe36   :  { %v1081_v50 = vmul.f32 0.03125, %v1077_v49 }
 0xe37   :  { %v1084_v51 = vadd.f32 1e-06, %v1082_v47 }
 0xe38   :  { %v1083_v52 = vadd.f32 1e-06, %v1081_v50 }
 0xe39   :  { %2777 = vrsqrt.f32 %v1084_v51 }
 0xe3a   :  { %2779 = vrsqrt.f32 %v1083_v52 }
 0xe43   :  { %v2778_v55 = vpop.eup %2777 }
 0xe44   :  { %v2780_v56 = vpop.eup %2779  ;;  %v1088_v57 = vmul.f32 %v2778_v55, %v1072_v29 }
 0xe45   :  { %v1087_v58 = vmul.f32 %v2780_v56, %v1071_v8 }
 0xe46   :  { %v1094_v60 = vmul.f32 %v1092_v54, %v1088_v57 }
 0xe47   :  { %v1093_v61 = vmul.f32 %v1092_v54, %v1087_v58 }
 0xe48   :  { %v1100_v0 = vadd.f32 %v1098_v59, %v1094_v60 }
 0xe49   :  { %v1099_v62 = vadd.f32 %v1098_v59, %v1093_v61 }
 0xe4b   :  { %2430 = vmatprep.mubr.msk.f32.mxu1 %vm144_vm1, %v1099_v62 }
 0xe4c   :  { %2431 = vmatmul.mubr.msk.f32.vlgmr.msra.gmra.mrb[14].mxu1 %vm144_vm1, %v1100_v0 }
 0xf1f   :  { %v2432_v5 = vpop.f32.mrb[14].mxu1 }
 0xf20   :  { %v1188_v7 = vadd.f32 %v2432_v5, %v1109_v1  ;;  %v1182_v10 = vpop.f32.mrb[15].mxu1 }
 0xf21   :  { %v1183_v48 = vadd.f32 %v1182_v10, %v1109_v1 }
 0xf22   :  { %v1192_v19 = vmul.f32 0.25, %v1188_v7 }
 0xf23   :  { %v3237_v18 = vpack.i.bf16 %v1188_v7, %v1183_v48  ;;  %v1191_v43 = vmul.f32 0.25, %v1183_v48 }
 0xf25   :  { %2731 = vrot.lane.b32.xlu1 %v3237_v18, %s2837_s24  ;;  %2726 = vrot.lane.b32.xlu0 %v3237_v18, %s2836_s23 }
 0xf26   :  { %2437 = vmatprep.mubr.msk.f32.mxu1 %vm282_vm3, %v1191_v43 }
 0xf29   :  { %1394 = vrot.lane.b32.xlu1 %v1191_v43, %s2838_s25 }
 0xf2d   :  { %1396 = vrot.lane.b32.xlu1 %v1192_v19, %s2838_s25 }
 0xf97   :  { %v2732_v16 = vpop.permute.xlu1 %2731  ;;  %v2727_v21 = vpop.permute.xlu0 %2726 }
 0xf98   :  { %v2734_v17 = vunpack.i.h.bf16 %v2732_v16  ;;  %v2733_v22 = vunpack.i.l.bf16 %v2732_v16  ;;  %v2729_v9 = vunpack.i.h.bf16 %v2727_v21  ;;  %v2728_v24 = vunpack.i.l.bf16 %v2727_v21 }
 0xf9a   :  { %v2628_v26 = vpack.c.bf16 %v2729_v9, %v2728_v24  ;;  %v2640_v27 = vpack.c.bf16 %v2734_v17, %v2733_v22 }
 0xf9b   :  { %v1395_v14 = vpop.permute.xlu1 %1394 }
 0xf9c   :  { %2630 = vmatprep.subr.msk.bf16.mxu1 %vm3049_vm4, %v2628_v26 }
 0xf9d   :  { %2633 = vmatpush3.bf16.xpose.msk.msra.mxu1 %vm3049_vm4, %v2628_v26 }
 0xf9e   :  { %2642 = vmatprep.subr.msk.bf16.mxu1 %vm3049_vm4, %v2640_v27 }
 0xf9f   :  { %v1397_v28 = vpop.permute.xlu1 %1396 }
 0xfa4   :  { %2438 = vmatmul.mubr.msk.f32.vlgmr.msra.gmra.mrb[16].mxu1 %vm282_vm3, %v1192_v19 }
 0xfa5   :  { %2645 = vmatpush3.bf16.xpose.msk.msra.mxu1 %vm3049_vm4, %v2640_v27  ;;  %2451 = vmatprep.mubr.msk.f32.mxu1 %vm282_vm3, %v1395_v14 }
 0xfac   :  { %2452 = vmatmul.mubr.msk.f32.vlgmr.msra.gmra.mrb[18].mxu1 %vm282_vm3, %v1397_v28 }
0x1077   :  { %v2439_v6 = vpop.f32.mrb[16].mxu1 }
0x1078   :  { %v1281_v29 = vadd.f32 %v2439_v6, %v3066_v41  ;;  %v1275_v8 = vpop.f32.mrb[17].mxu1 }
0x1079   :  { %v1276_v30 = vadd.f32 %v1275_v8, %v3061_v39  ;;  %v2225_v8 = vld [vmem:[%s3418_s1 + $0x80] sm:$0xff] }
0x107a   :  { %v1287_v32 = vsel %vm372_vm6, %v1281_v29, -inf }
0x107b   :  { %1288 = vmax.xlane.f32.xlu1 %v1287_v32  ;;  %v1284_v33 = vsel %vm368_vm5, %v1276_v30, -inf }
0x107c   :  { %1285 = vmax.xlane.f32.xlu0 %v1284_v33  ;;  %v2227_v33 = vld [vmem:[%s3418_s1 + $0x90] sm:$0xff] }
0x107f   :  { %v2453_v34 = vpop.f32.mrb[18].mxu1 }
0x1080   :  { %v1476_v37 = vpop.f32.mrb[19].mxu1  ;;  %v1482_v36 = vadd.f32 %v2453_v34, %v3066_v41  ;;  %v2228_v34 = vld [vmem:[%s3418_s1 + $0x98] sm:$0xff] }
0x1081   :  { %v1477_v35 = vadd.f32 %v1476_v37, %v3061_v39  ;;  %v2656_v37 = vpack.c.bf16 %v2228_v34, %v2227_v33  ;;  %v1888_v34 = vld [vmem:[%s3419_s2 + $0x118] sm:$0xff] }
0x1082   :  { %v1488_v42 = vsel %vm372_vm6, %v1482_v36, -inf }
0x1083   :  { %v1485_v40 = vsel %vm368_vm5, %v1477_v35, -inf }
0x1084   :  { %1486 = vmax.xlane.f32.xlu0 %v1485_v40 }
0x1088   :  { %1489 = vmax.xlane.f32.xlu0 %v1488_v42 }
0x1108   :  { %v1289_v44 = vpop.xlane.xlu1 %1288 }
0x1109   :  { %v1291_v45 = vsub.f32 %v1281_v29, %v1289_v44  ;;  %v1286_v46 = vpop.xlane.xlu0 %1285 }
0x110a   :  { %v1290_v47 = vsub.f32 %v1276_v30, %v1286_v46  ;;  %v2226_v30 = vld [vmem:[%s3418_s1 + $0x88] sm:$0xff] }
0x110b   :  { %v1294_v49 = vmul.f32 1.442695, %v1291_v45  ;;  %v2652_v32 = vpack.c.bf16 %v2226_v30, %v2225_v8 }
0x110c   :  { %v1292_v50 = vmul.f32 1.442695, %v1290_v47 }
0x110d   :  { %2781 = vpow2.f32 %v1294_v49  ;;  %v1608_v49 = vrot.slane %v3227_v53, %v694_v63 }
0x110e   :  { %2783 = vpow2.f32 %v1292_v50 }
0x110f   :  { %v1610_v50 = vadd.f32 %v1608_v49, %v3200_v15 }
0x1111   :  { %v1487_v51 = vpop.xlane.xlu0 %1486 }
0x1112   :  { %v1491_v52 = vsub.f32 %v1477_v35, %v1487_v51 }
0x1114   :  { %v1493_v54 = vmul.f32 1.442695, %v1491_v52  ;;  %v1609_v52 = vadd.f32 %v1608_v49, %v3202_v23 }
0x1115   :  { %v1490_v39 = vpop.xlane.xlu0 %1489 }
0x1116   :  { %2785 = vpow2.f32 %v1493_v54  ;;  %v1492_v41 = vsub.f32 %v1482_v36, %v1490_v39 }
0x1117   :  { %v2782_v55 = vpop.eup %2781 }
0x1118   :  { %v2784_v56 = vpop.eup %2783  ;;  %v1495_v57 = vmul.f32 1.442695, %v1492_v41  ;;  %v1299_v58 = vsel %vm372_vm6, %v2782_v55, 0.0 }
0x1119   :  { %1300 = vadd.xlane.f32.xlu1 %v1299_v58  ;;  %v1296_v59 = vsel %vm368_vm5, %v2784_v56, 0.0 }
0x111a   :  { %2787 = vpow2.f32 %v1495_v57  ;;  %1297 = vadd.xlane.f32.xlu0 %v1296_v59 }
0x1120   :  { %v2786_v60 = vpop.eup %2785 }
0x1121   :  { %v1497_v61 = vsel %vm368_vm5, %v2786_v60, 0.0 }
0x1122   :  { %1498 = vadd.xlane.f32.xlu0 %v1497_v61 }
0x1124   :  { %v2788_v62 = vpop.eup %2787 }
0x1125   :  { %v1500_v0 = vsel %vm372_vm6, %v2788_v62, 0.0 }
0x1126   :  { %1501 = vadd.xlane.f32.xlu1 %v1500_v0 }
0x1137   :  { %2741 = vrot.lane.b32.xlu1 %v3237_v18, %s2841_s30 }
0x1138   :  { %2736 = vrot.lane.b32.xlu0 %v3237_v18, %s2839_s5 }
0x11a6   :  { %v1301_v5 = vpop.xlane.xlu1 %1300 }
0x11a7   :  { %v1298_v1 = vpop.xlane.xlu0 %1297 }
0x11a8   :  { %2789 = vrcp.f32 %v1298_v1  ;;  %v2231_v1 = vld [vmem:[%s3418_s1 + $0xa0] sm:$0xff] }
0x11a9   :  { %2791 = vrcp.f32 %v1301_v5  ;;  %v2232_v5 = vld [vmem:[%s3418_s1 + $0xa8] sm:$0xff] }
0x11af   :  { %v1499_v7 = vpop.xlane.xlu0 %1498 }
0x11b0   :  { %2793 = vrcp.f32 %v1499_v7  ;;  %v2660_v7 = vpack.c.bf16 %v2232_v5, %v2231_v1 }
0x11b2   :  { %v2790_v10 = vpop.eup %2789  ;;  %2661 = vmatprep.subr.bf16.mxu1 %v2660_v7 }
0x11b3   :  { %v1502_v48 = vpop.xlane.xlu1 %1501  ;;  %v2737_v43 = vpop.permute.xlu0 %2736  ;;  %v1304_v19 = vmul.f32 %v2790_v10, %v2784_v56  ;;  %2663 = vmatpush3.bf16.msra.mxu1 %v2660_v7  ;;  %v2233_v10 = vld [vmem:[%s3418_s1 + $0xb0] sm:$0xff] }
0x11b4   :  { %2795 = vrcp.f32 %v1502_v48  ;;  %v2739_v16 = vunpack.i.h.bf16 %v2737_v43  ;;  %v2738_v21 = vunpack.i.l.bf16 %v2737_v43  ;;  %v2792_v22 = vpop.eup %2791  ;;  %v2234_v48 = vld [vmem:[%s3418_s1 + $0xb8] sm:$0xff] }
0x11b5   :  { %2444 = vmatprep.mubr.msk.f32.mxu0 %vm368_vm5, %v1304_v19  ;;  %v1305_v27 = vmul.f32 %v2792_v22, %v2782_v55  ;;  %v2664_v43 = vpack.c.bf16 %v2234_v48, %v2233_v10 }
0x11b6   :  { %v2634_v17 = vpack.c.bf16 %v2739_v16, %v2738_v21 }
0x11b7   :  { %v2742_v9 = vpop.permute.xlu1 %2741  ;;  %2665 = vmatprep.subr.bf16.mxu1 %v2664_v43 }
0x11b8   :  { %v2744_v24 = vunpack.i.h.bf16 %v2742_v9  ;;  %v2743_v18 = vunpack.i.l.bf16 %v2742_v9  ;;  %2636 = vmatprep.subr.msk.bf16.mxu0 %vm3076_vm9, %v2634_v17  ;;  %2667 = vmatpush3.bf16.msra.mxu1 %v2664_v43 }
0x11b9   :  { %2639 = vmatpush3.bf16.msk.msra.mxu0 %vm3076_vm9, %v2634_v17  ;;  %2684 = vmatprep.subr.bf16.mxu1 %v2835_v3 }
0x11ba   :  { %v2794_v26 = vpop.eup %2793  ;;  %v2646_v14 = vpack.c.bf16 %v2744_v24, %v2743_v18  ;;  %v1728_v24 = vrot.slane %v3227_v53, %v814_v38  ;;  %v1885_v38 = vld [vmem:[%s3419_s2 + $0x100] sm:$0xff] }
0x11bb   :  { %v1505_v28 = vmul.f32 %v2794_v26, %v2786_v60 }
0x11bc   :  { %2445 = vmatmul.mubr.msk.f32.vlgmr.msra.gmra.mrb[6].mxu0 %vm368_vm5, %v1305_v27  ;;  %2648 = vmatprep.subr.msk.bf16.mxu0 %vm3076_vm9, %v2646_v14  ;;  %v1734_v27 = vrot.slane %v3227_v53, %v820_v31  ;;  %v1887_v31 = vld [vmem:[%s3419_s2 + $0x110] sm:$0xff] }
0x11bd   :  { %2651 = vmatpush3.bf16.msk.msra.mxu0 %vm3076_vm9, %v2646_v14  ;;  %2458 = vmatprep.mubr.msk.f32.mxu0 %vm368_vm5, %v1505_v28 }
0x11be   :  { %v2796_v6 = vpop.eup %2795  ;;  %2653 = vmatprep.subr.bf16.mxu0 %v2652_v32 }
0x11bf   :  { %v1506_v29 = vmul.f32 %v2796_v6, %v2788_v62 }
0x11c1   :  { %2459 = vmatmul.mubr.msk.f32.vlgmr.msra.gmra.mrb[8].mxu0 %vm368_vm5, %v1506_v29 }
0x11c2   :  { %2655 = vmatpush3.bf16.msra.mxu0 %v2652_v32  ;;  %v1886_v32 = vld [vmem:[%s3419_s2 + $0x108] sm:$0xff] }
0x11c3   :  { %2657 = vmatprep.subr.bf16.mxu0 %v2656_v37  ;;  %v2668_v33 = vpack.c.bf16 %v1886_v32, %v1885_v38 }
0x11c6   :  { %2659 = vmatpush3.bf16.msra.mxu0 %v2656_v37  ;;  %v2672_v37 = vpack.c.bf16 %v1888_v34, %v1887_v31 }
0x11c7   :  { %2669 = vmatprep.subr.bf16.mxu0 %v2668_v33 }
0x128f   :  { %v2446_v35 = vpop.f32.mrb[6].mxu0 }
0x1290   :  { %v1385_v36 = vpop.f32.mrb[7].mxu0 }
0x1294   :  { %v2460_v40 = vpop.f32.mrb[8].mxu0 }
0x1295   :  { %v1586_v42 = vpop.f32.mrb[9].mxu0 }
0x1296   :  { %1597 = vrot.lane.b32.xlu1 %v1586_v42, %s2842_s4  ;;  %v1891_v42 = vld [vmem:[%s3419_s2 + $0x130] sm:$0xff] }
0x129a   :  { %1599 = vrot.lane.b32.xlu1 %v2460_v40, %s2842_s4 }
0x1308   :  { %v1598_v44 = vpop.permute.xlu1 %1597 }
0x1309   :  { %v1603_v45 = vsel %vm282_vm3, %v1385_v36, %v1598_v44  ;;  %v1890_v36 = vld [vmem:[%s3419_s2 + $0x128] sm:$0xff]  ;;  %v1892_v44 = vld [vmem:[%s3419_s2 + $0x138] sm:$0xff] }
0x130a   :  { %2469 = vmatprep.mubr.msk.f32.mxu0 %vm144_vm1, %v1603_v45  ;;  %v2680_v45 = vpack.c.bf16 %v1892_v44, %v1891_v42 }
0x130c   :  { %v1600_v46 = vpop.permute.xlu1 %1599 }
0x130d   :  { %v1604_v47 = vsel %vm282_vm3, %v2446_v35, %v1600_v46  ;;  %v1889_v35 = vld [vmem:[%s3419_s2 + $0x120] sm:$0xff]  ;;  %v1745_v46 = vrot.slane %v3227_v53, %v831_v2 }
0x130e   :  { %2470 = vmatmul.mubr.msk.f32.vlgmr.msra.gmra.mrb[10].mxu0 %vm144_vm1, %v1604_v47  ;;  %v2676_v40 = vpack.c.bf16 %v1890_v36, %v1889_v35 }
0x130f   :  { %2671 = vmatpush3.bf16.msra.mxu0 %v2668_v33 }
0x1310   :  { %2673 = vmatprep.subr.bf16.mxu0 %v2672_v37 }
0x1313   :  { %2675 = vmatpush3.bf16.msra.mxu0 %v2672_v37 }
0x1314   :  { %2677 = vmatprep.subr.bf16.mxu0 %v2676_v40 }
0x1317   :  { %2679 = vmatpush3.bf16.msra.mxu0 %v2676_v40 }
0x1318   :  { %2681 = vmatprep.subr.bf16.mxu0 %v2680_v45 }
0x131b   :  { %2683 = vmatpush3.bf16.msra.mxu0 %v2680_v45 }
0x13e1   :  { %v2471_v51 = vpop.f32.mrb[10].mxu0 }
0x13e2   :  { %v3308_v54 = vadd.f32 %v2471_v51, %v1610_v50  ;;  %v1688_v39 = vpop.f32.mrb[11].mxu0 }
0x13e3   :  { %v3310_v41 = vadd.f32 %v1688_v39, %v1609_v52 }
0x13e4   :  { %v1702_v55 = vsel %vm148_vm2, %v3308_v54, 0.0 }
0x13e5   :  { %1703 = vadd.xlane.f32.xlu1 %v1702_v55  ;;  %v1699_v56 = vsel %vm144_vm1, %v3310_v41, 0.0 }
0x13e6   :  { %1700 = vadd.xlane.f32.xlu0 %v1699_v56 }
0x1472   :  { %v1704_v57 = vpop.xlane.xlu1 %1703 }
0x1473   :  { %v1706_v63 = vmul.f32 0.03125, %v1704_v57  ;;  %v1701_v58 = vpop.xlane.xlu0 %1700 }
0x1474   :  { %v1705_v15 = vmul.f32 0.03125, %v1701_v58 }
0x1475   :  { %v1708_v59 = vsub.f32 %v3308_v54, %v1706_v63 }
0x1476   :  { %v1707_v23 = vsub.f32 %v3310_v41, %v1705_v15 }
0x1477   :  { %v1710_v62 = vmul.f32 %v1708_v59, %v1708_v59 }
0x1478   :  { %v1709_v60 = vmul.f32 %v1707_v23, %v1707_v23 }
0x1479   :  { %v1714_v0 = vsel %vm148_vm2, %v1710_v62, 0.0 }
0x147a   :  { %v1711_v61 = vsel %vm144_vm1, %v1709_v60, 0.0 }
0x147b   :  { %1712 = vadd.xlane.f32.xlu0 %v1711_v61 }
0x147f   :  { %1715 = vadd.xlane.f32.xlu0 %v1714_v0 }
0x1508   :  { %v1713_v19 = vpop.xlane.xlu0 %1712 }
0x1509   :  { %v1717_v16 = vmul.f32 0.03125, %v1713_v19 }
0x150b   :  { %v1719_v21 = vadd.f32 1e-06, %v1717_v16 }
0x150c   :  { %v1716_v17 = vpop.xlane.xlu0 %1715 }
0x150d   :  { %2797 = vrsqrt.f32 %v1719_v21  ;;  %v1718_v22 = vmul.f32 0.03125, %v1716_v17 }
0x150f   :  { %v1720_v9 = vadd.f32 1e-06, %v1718_v22 }
0x1511   :  { %2799 = vrsqrt.f32 %v1720_v9 }
0x1517   :  { %v2798_v18 = vpop.eup %2797 }
0x1518   :  { %v1723_v26 = vmul.f32 %v2798_v18, %v1707_v23 }
0x151a   :  { %v1729_v14 = vmul.f32 %v1728_v24, %v1723_v26 }
0x151b   :  { %v2800_v28 = vpop.eup %2799 }
0x151c   :  { %v1724_v6 = vmul.f32 %v2800_v28, %v1708_v59  ;;  %v1735_v29 = vadd.f32 %v1734_v27, %v1729_v14 }
0x151e   :  { %v1730_v8 = vmul.f32 %v1728_v24, %v1724_v6  ;;  %2480 = vmatprep.mubr.msk.f32.mxu1 %vm144_vm1, %v1735_v29 }
0x1520   :  { %v1736_v30 = vadd.f32 %v1734_v27, %v1730_v8 }
0x1522   :  { %2481 = vmatmul.mubr.msk.f32.vlgmr.msra.gmra.mrb[20].mxu1 %vm144_vm1, %v1736_v30 }
0x15f5   :  { %v2482_v47 = vpop.f32.mrb[20].mxu1 }
0x15f6   :  { %v1824_v49 = vadd.f32 %v2482_v47, %v1745_v46  ;;  %v1818_v50 = vpop.f32.mrb[21].mxu1  ;;  %v2844_v47 = vmov 0.0  }
0x15f7   :  { %v1819_v51 = vadd.f32 %v1818_v50, %v1745_v46  ;;  %2506 = vmatprep.mubr.msk.f32.mxu1 %vm2843_vm14, %v2844_v47  ;;  %v1882_v50 = vrot.slane %v3227_v53, %v968_v20 }
0x15f8   :  { %v1830_v52 = vmul.f32 0.70710677, %v1824_v49  ;;  %v1828_v44 = vmul.f32 0.5, %v1824_v49 }
0x15f9   :  { %v1829_v39 = vmul.f32 0.70710677, %v1819_v51  ;;  %v1827_v40 = vmul.f32 0.5, %v1819_v51  ;;  %v1883_v51 = vadd.f32 %v1882_v50, %v3310_v41 }
0x15fa   :  { %v1832_v55 = vand.u32 2147483647, %v1830_v52  ;;  %vm1870_vm12 = vcmp.ge.f32.partialorder %v1830_v52, 0.0  ;;  %v1884_v52 = vadd.f32 %v1882_v50, %v3308_v54 }
0x15fb   :  { %v1831_v56 = vand.u32 2147483647, %v1829_v39  ;;  %vm1869_vm13 = vcmp.ge.f32.partialorder %v1829_v39, 0.0 }
0x15fc   :  { %v1834_v57 = vmul.f32 0.3275911, %v1832_v55  ;;  %v1858_v59 = vsub.f32 0.0, %v1832_v55 }
0x15fd   :  { %v1833_v63 = vmul.f32 0.3275911, %v1831_v56  ;;  %v1857_v23 = vsub.f32 0.0, %v1831_v56 }
0x15fe   :  { %v1836_v58 = vadd.f32 1.0, %v1834_v57  ;;  %v1860_v61 = vmul.f32 %v1858_v59, %v1832_v55  ;;  %v2241_v59 = vld [vmem:[%s3418_s1 + $0xc0] sm:$0xff] }
0x15ff   :  { %v1835_v15 = vadd.f32 1.0, %v1833_v63  ;;  %v1859_v0 = vmul.f32 %v1857_v23, %v1831_v56  ;;  %v1976_v63 = vld [vmem:[%s3423_s6] sm:$0x3]  ;;  %v2242_v23 = vld [vmem:[%s3418_s1 + $0xc8] sm:$0xff] }
0x1600   :  { %2801 = vrcp.f32 %v1836_v58  ;;  %v1863_v7 = vmul.f32 1.442695, %v1860_v61  ;;  %v2243_v61 = vld [vmem:[%s3418_s1 + $0xd0] sm:$0xff] }
0x1601   :  { %2803 = vrcp.f32 %v1835_v15  ;;  %v1861_v43 = vmul.f32 1.442695, %v1859_v0 }
0x1602   :  { %2805 = vpow2.f32 %v1863_v7  ;;  %v31_v7 = vld [vmem:[%s3420_s3 + $0x10] sm:$0x7] }
0x1603   :  { %2807 = vpow2.f32 %v1861_v43 }
0x160a   :  { %v2802_v60 = vpop.eup %2801 }
0x160b   :  { %v2804_v62 = vpop.eup %2803  ;;  %v1840_v2 = vmul.f32 1.0614054, %v2802_v60 }
0x160c   :  { %v1839_v1 = vmul.f32 1.0614054, %v2804_v62  ;;  %v2806_v6 = vpop.eup %2805 }
0x160d   :  { %v1842_v5 = vadd.f32 -1.4531521, %v1840_v2  ;;  %v2808_v8 = vpop.eup %2807 }
0x160e   :  { %v1841_v10 = vadd.f32 -1.4531521, %v1839_v1 }
0x160f   :  { %v1844_v48 = vmul.f32 %v2802_v60, %v1842_v5 }
0x1610   :  { %v1843_v19 = vmul.f32 %v2804_v62, %v1841_v10 }
0x1611   :  { %v1846_v16 = vadd.f32 1.4214138, %v1844_v48  ;;  %v2074_v48 = vrot.slane %v31_v7, %v3020_v13 }
0x1612   :  { %v1845_v21 = vadd.f32 1.4214138, %v1843_v19 }
0x1613   :  { %v1848_v17 = vmul.f32 %v2802_v60, %v1846_v16 }
0x1614   :  { %v1847_v22 = vmul.f32 %v2804_v62, %v1845_v21  ;;  %v2084_v21 = vrot.slane %v31_v7, %v3034_v25 }
0x1615   :  { %v1850_v9 = vadd.f32 -0.28449672, %v1848_v17 }
0x1616   :  { %v1849_v24 = vadd.f32 -0.28449672, %v1847_v22 }
0x1617   :  { %v1852_v18 = vmul.f32 %v2802_v60, %v1850_v9 }
0x1618   :  { %v1851_v26 = vmul.f32 %v2804_v62, %v1849_v24 }
0x1619   :  { %v1854_v27 = vadd.f32 0.2548296, %v1852_v18 }
0x161a   :  { %v1853_v14 = vadd.f32 0.2548296, %v1851_v26 }
0x161b   :  { %v1856_v28 = vmul.f32 %v2802_v60, %v1854_v27  ;;  %v2689_v60 = vpack.c.bf16 %v2242_v23, %v2241_v59 }
0x161c   :  { %v1855_v29 = vmul.f32 %v2804_v62, %v1853_v14  ;;  %v2244_v62 = vld [vmem:[%s3418_s1 + $0xd8] sm:$0xff]  ;;  %s2845_s1 = smov [#allocation2]  }
0x161d   :  { %v1866_v30 = vmul.f32 %v2806_v6, %v1856_v28  ;;  %v2692_v2 = vpack.c.bf16 %v2244_v62, %v2243_v61  ;;  %s2165_s19 = sshll.u32 %s2845_s1, 4  ;;  %s2166_s19 = int_to_ptr.vmem [resolvable:$true] %s2165_s19 }
0x161e   :  { %v1865_v38 = vmul.f32 %v2808_v8, %v1855_v29  ;;  %s2811_s3 = scalar_lea.vmem %s2166_s19, 32  ;;  %p2816_p1 = scmp.lt.s32.totalorder %s2166_s19, %s2166_s19 }
0x161f   :  { %v1868_v32 = vsub.f32 1.0, %v1866_v30  ;;  %p2812_p0 = scmp.ne.s32.totalorder %s2166_s19, %s2811_s3  ;;  %p2817_p2 = scmp.lt.s32.totalorder %s2811_s3, %s2811_s3 }
0x1620   :  { %v1867_v33 = vsub.f32 1.0, %v1865_v38 }
0x1621   :  { %v1872_v31 = vsub.f32 0.0, %v1868_v32  ;;  %p2818_p3 = por %p2817_p2, %p2816_p1 }
0x1622   :  { %v1871_v34 = vsub.f32 0.0, %v1867_v33 }
0x1623   :  { %v1874_v37 = vsel %vm1870_vm12, %v1868_v32, %v1872_v31  ;;  %p2819_p4 = pnand %p2818_p3, %p2812_p0 }
0x1624   :  { %v1876_v35 = vadd.f32 1.0, %v1874_v37  ;;  %v1873_v36 = vsel %vm1869_vm13, %v1867_v33, %v1871_v34 }
0x1625   :  { %v1875_v42 = vadd.f32 1.0, %v1873_v36 }
0x1626   :  { %v1878_v46 = vmul.f32 %v1876_v35, %v1828_v44 }
0x1627   :  { %v1877_v45 = vmul.f32 %v1875_v42, %v1827_v40 }
0x1629   :  { %2499 = vmatprep.mubr.msk.f32.mxu0 %vm62_vm0, %v1877_v45 }
0x162a   :  { %2500 = vmatmul.mubr.msk.f32.vlgmr.msra.gmra.mrb[12].mxu0 %vm62_vm0, %v1878_v46 }
0x16fd   :  { %v2501_v39 = vpop.f32.mrb[12].mxu0 }
0x16fe   :  { %v1975_v55 = vadd.f32 %v2501_v39, %v1884_v52  ;;  %v1965_v49 = vpop.f32.mrb[13].mxu0 }
0x16ff   :  { %v1974_v56 = vadd.f32 %v1965_v49, %v1883_v51 }
0x1701   :  { %v2685_v57 = vpack.c.bf16 %v1975_v55, %v1974_v56 }
0x1703   :  { %2687 = vmatpush3.bf16.msk.msra.mxu1 %vm3076_vm9, %v2685_v57 }
0x1704   :  { %2688 = vmatprep.subr.bf16.mxu1 %v2835_v3 }
0x1706   :  { %2507 = vmatmul.mubr.msk.f32.vlgmr.msra.gmra.mrb[22].mxu1 %vm368_vm5, %v1976_v63 }
0x1707   :  { %2517 = vmatprep.mubr.msk.f32.mxu1 %vm2843_vm14, %v2844_v47  ;;  %2690 = vmatpush3.bf16.msra.mxu1 %v2689_v60 }
0x1708   :  { %2691 = vmatprep.subr.bf16.mxu1 %v2835_v3  ;;  %v2069_v3 = vrot.slane %v31_v7, %v3017_v12 }
0x170b   :  { %2693 = vmatpush3.bf16.msra.mxu1 %v2692_v2 }
0x17d9   :  { %v2049_v11 = vpop.f32.mrb[22].mxu1 }
0x17da   :  { %v2508_v20 = vpop.f32.mrb[23].mxu1  ;;  %v2053_v53 = vsel %vm148_vm2, %v2049_v11, 0.0 }
0x17db   :  { %2054 = vadd.xlane.f32.xlu0 %v2053_v53 }
0x1868   :  { %v2055_v54 = vpop.xlane.xlu0 %2054 }
0x1869   :  { %v2056_v41 = vmul.f32 0.03125, %v2055_v54 }
0x186b   :  { %v2057_v58 = vsub.f32 %v2049_v11, %v2056_v41 }
0x186d   :  { %v2058_v15 = vmul.f32 %v2057_v58, %v2057_v58 }
0x186f   :  { %v2059_v4 = vsel %vm148_vm2, %v2058_v15, 0.0 }
0x1870   :  { %2060 = vadd.xlane.f32.xlu1 %v2059_v4 }
0x18fd   :  { %v2061_v0 = vpop.xlane.xlu1 %2060 }
0x18fe   :  { %v2062_v1 = vmul.f32 0.03125, %v2061_v0 }
0x1900   :  { %v2063_v5 = vadd.f32 1e-06, %v2062_v1 }
0x1902   :  { %2809 = vrsqrt.f32 %v2063_v5 }
0x190c   :  { %v2810_v10 = vpop.eup %2809 }
0x190d   :  { %v2065_v43 = vmul.f32 %v2810_v10, %v2057_v58 }
0x190f   :  { %v2070_v19 = vmul.f32 %v2069_v3, %v2065_v43 }
0x1911   :  { %v2075_v16 = vadd.f32 %v2074_v48, %v2070_v19 }
0x1913   :  { %2518 = vmatmul.mubr.msk.f32.vlgmr.msra.gmra.mrb[24].mxu1 %vm144_vm1, %v2075_v16 }
0x19e6   :  { %v2154_v17 = vpop.f32.mrb[24].mxu1 }
0x19e7   :  { %v2155_v22 = vadd.f32 %v2154_v17, %v2084_v21  ;;  %v2519_v9 = vpop.f32.mrb[25].mxu1 }
0x19e9   :  { %2158 = vst.msk [vmem:[#allocation2] sm:$0x3] %vm372_vm6, %v2155_v22 }
0x19ea   :  { %2822 = shalt.err (!%p2819_p4)
}
0x19eb   :  { %s2823_s22 = scalar_lea.hbm %s3424_s7, 32 }
0x19ec   :  { %p2824_p5 = scmp.ne.s32.totalorder %s3424_s7, %s2823_s22  ;;  %p2827_p6 = scmp.lt.u32.totalorder %s2823_s22, %s3424_s7 }
0x19ee   :  { %p2829_p7 = pnand %p2827_p6, %p2824_p5 }
0x19f0   :  { %2832 = shalt.err (!%p2829_p7)
}
0x19f1   :  { %2168 = dma.vmem_to_hbm [thread:$0]  %s2166_s19, 32, %s3424_s7, [#allocation3]  }
0x19f2   :  { %2833 = dma.done.wait [#allocation3], 32  }
0x19f3   :  { %2834 = vsyncadd [#allocation3], 4294967264 }
0x19f4   :  { %2172 = vsyncpa [#allocation3], 1 }

</bundles_post_ra>
